<compile_context>
chip_gen: v5e
topology: v5e:2x2
jax: 0.10.0
libtpu: 0.0.40
codegen_flags: <defaults>
</compile_context>

<pallas_src>
import numpy as np
import jax
import jax.numpy as jnp
from jax.experimental import pallas as pl
from jax.experimental.pallas import tpu as pltpu

# ---- small, deterministic problem sizes (consistent with the module) ----
B, T, D = 2, 8, 32          # batch, time, model size (in_size == size == D)
H, DK = 4, 8                # heads, per-head dim (D = H * DK)
FFN = 64                    # feed-forward hidden size
K = 5                       # FSMN depthwise-conv kernel size
SANM_SHIFT = 0
LEFT = (K - 1) // 2 + SANM_SHIFT
RIGHT = K - 1 - LEFT
EPS = 1e-12                 # torch LayerNorm eps used by the module

PARAM_ORDER = ["g1", "be1", "g2", "be2",
               "wq", "bq", "wk", "bk", "wv", "bv",
               "wf", "wo", "bo",
               "w1", "b1", "w2", "b2"]


def _layernorm(x, gamma, beta):
    mu = jnp.mean(x, axis=-1, keepdims=True)
    var = jnp.mean((x - mu) ** 2, axis=-1, keepdims=True)
    return (x - mu) * jax.lax.rsqrt(var + EPS) * gamma + beta


def encoder_layer_kernel(x_ref, km_ref, fm_ref,
                         g1_ref, be1_ref, g2_ref, be2_ref,
                         wqkv_ref, bqkv_ref, wf_ref,
                         wo_ref, bo_ref, w1_ref, b1_ref, w2_ref, b2_ref,
                         o_ref):
    f32, bf16 = jnp.float32, jnp.bfloat16
    x = x_ref[...]                      # (B*T, D) f32
    kmask = km_ref[...]                 # (B, T)   key-axis mask
    fmask = fm_ref[...]                 # (B*T, 1) frame mask
    wf = wf_ref[...]                    # (K, D)   depthwise conv weight, f32

    # ---- LayerNorm1 + fused q/k/v projection on all B*T rows (1 MXU issue) ----
    xn = _layernorm(x, g1_ref[...], be1_ref[...])
    qkv = jnp.dot(xn.astype(bf16), wqkv_ref[...],
                  preferred_element_type=f32) + bqkv_ref[...]      # (B*T, 3D)
    q = qkv[:, :D] * (DK ** -0.5)
    k = qkv[:, D:2 * D]
    v = qkv[:, 2 * D:]

    neg = jnp.finfo(f32).min
    t_idx = jax.lax.broadcasted_iota(jnp.int32, (T, D), 0)
    lane = jax.lax.broadcasted_iota(jnp.int32, (T, D), 1)
    # FSMN time-boundary masks (one per tap) and per-head lane masks, hoisted
    # out of the batch loop so the broadcasts are emitted only once.
    tap_valid = [jnp.logical_and(t_idx + (kk - LEFT) >= 0,
                                 t_idx + (kk - LEFT) < T) for kk in range(K)]
    head_lane = [jnp.logical_and(lane >= h * DK, lane < (h + 1) * DK)
                 for h in range(H)]

    # ---- attention + FSMN memory, unrolled over the small batch ------------
    for b in range(B):                              # B=2, fully unrolled
        r0, r1 = b * T, (b + 1) * T
        qb, kb, vb = q[r0:r1, :], k[r0:r1, :], v[r0:r1, :]
        fm_b = fmask[r0:r1, :]                       # (T, 1)
        key_invalid = kmask[b:b + 1, :] == 0.0       # (1, T) broadcasts over q

        # FSMN: depthwise conv1d over time (groups=D, no bias) via XLU rolls.
        v_m = vb * fm_b
        conv = jnp.zeros((T, D), f32)
        for kk in range(K):                          # K=5, unrolled
            d = kk - LEFT
            sh = v_m if d == 0 else pltpu.roll(v_m, shift=(-d) % T, axis=0)
            conv = conv + jnp.where(tap_valid[kk], sh, 0.0) * wf[kk:kk + 1, :]
        fsmn = (conv + v_m) * fm_b

        # Multi-head attention; output projection fused into one wo matmul.
        ctx = jnp.zeros((T, D), f32)
        for h in range(H):                           # H=4, unrolled
            hs = slice(h * DK, (h + 1) * DK)
            sc = jax.lax.dot_general(qb[:, hs].astype(bf16),
                                     kb[:, hs].astype(bf16),
                                     (((1,), (1,)), ((), ())),
                                     preferred_element_type=f32)   # (T, T)
            sc = jnp.where(key_invalid, neg, sc)
            sc = sc - jnp.max(sc, axis=-1, keepdims=True)
            e = jnp.exp(sc)
            attn = e * pl.reciprocal(jnp.sum(e, axis=-1, keepdims=True),
                                     approx=True)
            attn = jnp.where(key_invalid, 0.0, attn)
            # v with only head h's lanes kept: accumulating attn_h @ v_h builds
            # the concatenated (T, D) context with full-width MXU outputs.
            v_h = jnp.where(head_lane[h], vb, 0.0)
            ctx = ctx + jnp.dot(attn.astype(bf16), v_h.astype(bf16),
                                preferred_element_type=f32)
        att = jnp.dot(ctx.astype(bf16), wo_ref[...],
                      preferred_element_type=f32) + bo_ref[...]

        # Stage x1 rows in the output ref (VMEM) so the FFN runs on all rows.
        o_ref[r0:r1, :] = x[r0:r1, :] + att + fsmn   # residual + att + fsmn

    # ---- feed-forward block on all B*T rows at once -------------------------
    x1 = o_ref[...]
    xn2 = _layernorm(x1, g2_ref[...], be2_ref[...])
    hdn = jnp.maximum(jnp.dot(xn2.astype(bf16), w1_ref[...],
                              preferred_element_type=f32) + b1_ref[...], 0.0)
    ffn = jnp.dot(hdn.astype(bf16), w2_ref[...],
                  preferred_element_type=f32) + b2_ref[...]
    o_ref[...] = (x1 + ffn).astype(o_ref.dtype)


@jax.jit
def encoder_layer_sanm(x, mask, params):
    """x: (B, T, D) f32; mask: (B, 1, T) f32 (1.0 valid / 0.0 pad)."""
    b, t, d = x.shape
    x2 = x.reshape(b * t, d)                # fold batch into the row dimension
    kmask = mask.reshape(b, t)              # key-axis mask, one row per batch
    fmask = mask.reshape(b * t, 1)          # frame mask (== torch mask.reshape(b,-1,1))
    bf16 = jnp.bfloat16
    wqkv = jnp.concatenate([params["wq"], params["wk"], params["wv"]], axis=1)
    bqkv = jnp.concatenate([params["bq"], params["bk"], params["bv"]], axis=1)
    args = (x2, kmask, fmask,
            params["g1"], params["be1"], params["g2"], params["be2"],
            wqkv.astype(bf16), bqkv, params["wf"],
            params["wo"].astype(bf16), params["bo"],
            params["w1"].astype(bf16), params["b1"],
            params["w2"].astype(bf16), params["b2"])
    out2 = pl.pallas_call(
        encoder_layer_kernel,
        out_shape=jax.ShapeDtypeStruct((b * t, d), jnp.float32),
    )(*args)
    return out2.reshape(b, t, d)


def make_params(key):
    ks = jax.random.split(key, len(PARAM_ORDER) + 1)
    n = lambda k, s, sc=0.1: jax.random.normal(k, s, jnp.float32) * sc
    return dict(
        g1=1.0 + n(ks[0], (1, D)), be1=n(ks[1], (1, D)),
        g2=1.0 + n(ks[2], (1, D)), be2=n(ks[3], (1, D)),
        wq=n(ks[4], (D, D)), bq=n(ks[5], (1, D)),
        wk=n(ks[6], (D, D)), bk=n(ks[7], (1, D)),
        wv=n(ks[8], (D, D)), bv=n(ks[9], (1, D)),
        wf=n(ks[10], (K, D)),                 # depthwise conv weight, (kernel, channel)
        wo=n(ks[11], (D, D)), bo=n(ks[12], (1, D)),
        w1=n(ks[13], (D, FFN)), b1=n(ks[14], (1, FFN)),
        w2=n(ks[15], (FFN, D)), b2=n(ks[16], (1, D)),
    )


def reference(x, mask, p):
    """Pure-JAX f32 reference mirroring the torch forward (eval mode)."""
    mrow = mask
    mcol = jnp.transpose(mask, (0, 2, 1))
    residual = x
    xn = _layernorm(x, p["g1"], p["be1"])
    q = xn @ p["wq"] + p["bq"]
    k = xn @ p["wk"] + p["bk"]
    v = xn @ p["wv"] + p["bv"]
    # FSMN
    v_m = v * mcol
    pad = jnp.pad(v_m, ((0, 0), (LEFT, RIGHT), (0, 0)))
    conv = sum(pad[:, kk:kk + T, :] * p["wf"][kk] for kk in range(K))
    fsmn = (conv + v_m) * mcol
    # attention
    qh = q.reshape(B, T, H, DK).transpose(0, 2, 1, 3) * (DK ** -0.5)
    kh = k.reshape(B, T, H, DK).transpose(0, 2, 1, 3)
    vh = v.reshape(B, T, H, DK).transpose(0, 2, 1, 3)
    sc = qh @ kh.transpose(0, 1, 3, 2)
    keyinv = (mrow[:, :, None, :] == 0.0)
    sc = jnp.where(keyinv, jnp.finfo(jnp.float32).min, sc)
    attn = jax.nn.softmax(sc, axis=-1)
    attn = jnp.where(keyinv, 0.0, attn)
    ctx = (attn @ vh).transpose(0, 2, 1, 3).reshape(B, T, D)
    att = ctx @ p["wo"] + p["bo"]
    x1 = residual + att + fsmn
    xn2 = _layernorm(x1, p["g2"], p["be2"])
    ffn = jnp.maximum(xn2 @ p["w1"] + p["b1"], 0.0) @ p["w2"] + p["b2"]
    return x1 + ffn


if __name__ == "__main__":
    key = jax.random.PRNGKey(0)
    kx, kp = jax.random.split(key)
    x = jax.random.normal(kx, (B, T, D), jnp.float32)
    mask = jnp.ones((B, 1, T), jnp.float32)
    mask = mask.at[1, 0, T - 2:].set(0.0)     # batch 1 has 2 padded frames
    params = make_params(kp)

    out = jax.block_until_ready(encoder_layer_sanm(x, mask, params))

    ref = reference(x, mask, params)
    err = float(np.max(np.abs(np.asarray(out) - np.asarray(ref))))
    # bf16 MXU operands with f32 accumulation -> compare at bf16-level tolerance.
    assert np.allclose(np.asarray(out), np.asarray(ref), rtol=3e-2, atol=3e-2), err
    print("KERNEL_OK")
</pallas_src>

<mosaic_0001>
module attributes {stable_mosaic.version = 11 : i64} {
  func.func @encoder_layer_kernel(%arg0: memref<16x32xf32, #tpu.memory_space<vmem>>, %arg1: memref<2x8xf32, #tpu.memory_space<vmem>>, %arg2: memref<16x1xf32, #tpu.memory_space<vmem>>, %arg3: memref<1x32xf32, #tpu.memory_space<vmem>>, %arg4: memref<1x32xf32, #tpu.memory_space<vmem>>, %arg5: memref<1x32xf32, #tpu.memory_space<vmem>>, %arg6: memref<1x32xf32, #tpu.memory_space<vmem>>, %arg7: memref<32x96xbf16, #tpu.memory_space<vmem>>, %arg8: memref<1x96xf32, #tpu.memory_space<vmem>>, %arg9: memref<5x32xf32, #tpu.memory_space<vmem>>, %arg10: memref<32x32xbf16, #tpu.memory_space<vmem>>, %arg11: memref<1x32xf32, #tpu.memory_space<vmem>>, %arg12: memref<32x64xbf16, #tpu.memory_space<vmem>>, %arg13: memref<1x64xf32, #tpu.memory_space<vmem>>, %arg14: memref<64x32xbf16, #tpu.memory_space<vmem>>, %arg15: memref<1x32xf32, #tpu.memory_space<vmem>>, %arg16: memref<16x32xf32, #tpu.memory_space<vmem>>) attributes {dimension_semantics = [], scalar_prefetch = 0 : i64, scratch_operands = 0 : i64, tpu.core_type = #tpu.core_type<tc>} {
    %c0 = arith.constant 0 : index
    %c0_0 = arith.constant 0 : index
    %0 = vector.load %arg0[%c0, %c0_0] : memref<16x32xf32, #tpu.memory_space<vmem>>, vector<16x32xf32>
    %c0_1 = arith.constant 0 : index
    %c0_2 = arith.constant 0 : index
    %1 = vector.load %arg1[%c0_1, %c0_2] : memref<2x8xf32, #tpu.memory_space<vmem>>, vector<2x8xf32>
    %c0_3 = arith.constant 0 : index
    %c0_4 = arith.constant 0 : index
    %2 = vector.load %arg2[%c0_3, %c0_4] : memref<16x1xf32, #tpu.memory_space<vmem>>, vector<16x1xf32>
    %c0_5 = arith.constant 0 : index
    %c0_6 = arith.constant 0 : index
    %3 = vector.load %arg9[%c0_5, %c0_6] : memref<5x32xf32, #tpu.memory_space<vmem>>, vector<5x32xf32>
    %c0_7 = arith.constant 0 : index
    %c0_8 = arith.constant 0 : index
    %4 = vector.load %arg3[%c0_7, %c0_8] : memref<1x32xf32, #tpu.memory_space<vmem>>, vector<1x32xf32>
    %c0_9 = arith.constant 0 : index
    %c0_10 = arith.constant 0 : index
    %5 = vector.load %arg4[%c0_9, %c0_10] : memref<1x32xf32, #tpu.memory_space<vmem>>, vector<1x32xf32>
    %cst = arith.constant dense<0.000000e+00> : vector<16xf32>
    %6 = vector.multi_reduction <add>, %0, %cst [1] : vector<16x32xf32> to vector<16xf32>
    %7 = vector.shape_cast %6 : vector<16xf32> to vector<16x1xf32>
    %cst_11 = arith.constant 3.200000e+01 : f32
    %8 = vector.broadcast %cst_11 : f32 to vector<16x1xf32>
    %9 = arith.divf %7, %8 : vector<16x1xf32>
    %10 = vector.broadcast %9 : vector<16x1xf32> to vector<16x32xf32>
    %11 = arith.subf %0, %10 : vector<16x32xf32>
    %12 = arith.mulf %11, %11 : vector<16x32xf32>
    %cst_12 = arith.constant dense<0.000000e+00> : vector<16xf32>
    %13 = vector.multi_reduction <add>, %12, %cst_12 [1] : vector<16x32xf32> to vector<16xf32>
    %14 = vector.shape_cast %13 : vector<16xf32> to vector<16x1xf32>
    %cst_13 = arith.constant 3.200000e+01 : f32
    %15 = vector.broadcast %cst_13 : f32 to vector<16x1xf32>
    %16 = arith.divf %14, %15 : vector<16x1xf32>
    %17 = vector.broadcast %9 : vector<16x1xf32> to vector<16x32xf32>
    %18 = arith.subf %0, %17 : vector<16x32xf32>
    %cst_14 = arith.constant 9.99999996E-13 : f32
    %19 = vector.broadcast %cst_14 : f32 to vector<16x1xf32>
    %20 = arith.addf %16, %19 : vector<16x1xf32>
    %21 = math.rsqrt %20 : vector<16x1xf32>
    %22 = vector.broadcast %21 : vector<16x1xf32> to vector<16x32xf32>
    %23 = arith.mulf %18, %22 : vector<16x32xf32>
    %24 = vector.broadcast %4 : vector<1x32xf32> to vector<16x32xf32>
    %25 = arith.mulf %23, %24 : vector<16x32xf32>
    %26 = vector.broadcast %5 : vector<1x32xf32> to vector<16x32xf32>
    %27 = arith.addf %25, %26 : vector<16x32xf32>
    %28 = arith.truncf %27 : vector<16x32xf32> to vector<16x32xbf16>
    %c0_15 = arith.constant 0 : index
    %c0_16 = arith.constant 0 : index
    %29 = vector.load %arg7[%c0_15, %c0_16] : memref<32x96xbf16, #tpu.memory_space<vmem>>, vector<32x96xbf16>
    %cst_17 = arith.constant dense<0.000000e+00> : vector<16x96xf32>
    %30 = tpu.matmul %28, %29, %cst_17 {dimension_numbers = #tpu.dot_dimension_numbers<[1], [0], [0], [1], [0, 0, 1, 1], [], []>} : vector<16x32xbf16>, vector<32x96xbf16>, vector<16x96xf32> -> vector<16x96xf32>
    %c0_18 = arith.constant 0 : index
    %c0_19 = arith.constant 0 : index
    %31 = vector.load %arg8[%c0_18, %c0_19] : memref<1x96xf32, #tpu.memory_space<vmem>>, vector<1x96xf32>
    %32 = vector.broadcast %31 : vector<1x96xf32> to vector<16x96xf32>
    %33 = arith.addf %30, %32 : vector<16x96xf32>
    %34 = vector.extract_strided_slice %33 {offsets = [0, 0], sizes = [16, 32], strides = [1, 1]} : vector<16x96xf32> to vector<16x32xf32>
    %cst_20 = arith.constant 0.353553385 : f32
    %35 = vector.broadcast %cst_20 : f32 to vector<16x32xf32>
    %36 = arith.mulf %34, %35 : vector<16x32xf32>
    %37 = vector.extract_strided_slice %33 {offsets = [0, 32], sizes = [16, 32], strides = [1, 1]} : vector<16x96xf32> to vector<16x32xf32>
    %38 = vector.extract_strided_slice %33 {offsets = [0, 64], sizes = [16, 32], strides = [1, 1]} : vector<16x96xf32> to vector<16x32xf32>
    %39 = tpu.iota {dimensions = array<i32: 0>} : vector<8x32xi32>
    %40 = tpu.iota {dimensions = array<i32: 1>} : vector<8x32xi32>
    %c-2_i32 = arith.constant -2 : i32
    %41 = vector.broadcast %c-2_i32 : i32 to vector<8x32xi32>
    %42 = arith.addi %39, %41 : vector<8x32xi32>
    %c0_i32 = arith.constant 0 : i32
    %43 = vector.broadcast %c0_i32 : i32 to vector<8x32xi32>
    %44 = arith.cmpi sge, %42, %43 : vector<8x32xi32>
    %c-2_i32_21 = arith.constant -2 : i32
    %45 = vector.broadcast %c-2_i32_21 : i32 to vector<8x32xi32>
    %46 = arith.addi %39, %45 : vector<8x32xi32>
    %c8_i32 = arith.constant 8 : i32
    %47 = vector.broadcast %c8_i32 : i32 to vector<8x32xi32>
    %48 = arith.cmpi slt, %46, %47 : vector<8x32xi32>
    %49 = arith.andi %44, %48 : vector<8x32xi1>
    %c-1_i32 = arith.constant -1 : i32
    %50 = vector.broadcast %c-1_i32 : i32 to vector<8x32xi32>
    %51 = arith.addi %39, %50 : vector<8x32xi32>
    %c0_i32_22 = arith.constant 0 : i32
    %52 = vector.broadcast %c0_i32_22 : i32 to vector<8x32xi32>
    %53 = arith.cmpi sge, %51, %52 : vector<8x32xi32>
    %c-1_i32_23 = arith.constant -1 : i32
    %54 = vector.broadcast %c-1_i32_23 : i32 to vector<8x32xi32>
    %55 = arith.addi %39, %54 : vector<8x32xi32>
    %c8_i32_24 = arith.constant 8 : i32
    %56 = vector.broadcast %c8_i32_24 : i32 to vector<8x32xi32>
    %57 = arith.cmpi slt, %55, %56 : vector<8x32xi32>
    %58 = arith.andi %53, %57 : vector<8x32xi1>
    %c0_i32_25 = arith.constant 0 : i32
    %59 = vector.broadcast %c0_i32_25 : i32 to vector<8x32xi32>
    %60 = arith.addi %39, %59 : vector<8x32xi32>
    %c0_i32_26 = arith.constant 0 : i32
    %61 = vector.broadcast %c0_i32_26 : i32 to vector<8x32xi32>
    %62 = arith.cmpi sge, %60, %61 : vector<8x32xi32>
    %c0_i32_27 = arith.constant 0 : i32
    %63 = vector.broadcast %c0_i32_27 : i32 to vector<8x32xi32>
    %64 = arith.addi %39, %63 : vector<8x32xi32>
    %c8_i32_28 = arith.constant 8 : i32
    %65 = vector.broadcast %c8_i32_28 : i32 to vector<8x32xi32>
    %66 = arith.cmpi slt, %64, %65 : vector<8x32xi32>
    %67 = arith.andi %62, %66 : vector<8x32xi1>
    %c1_i32 = arith.constant 1 : i32
    %68 = vector.broadcast %c1_i32 : i32 to vector<8x32xi32>
    %69 = arith.addi %39, %68 : vector<8x32xi32>
    %c0_i32_29 = arith.constant 0 : i32
    %70 = vector.broadcast %c0_i32_29 : i32 to vector<8x32xi32>
    %71 = arith.cmpi sge, %69, %70 : vector<8x32xi32>
    %c1_i32_30 = arith.constant 1 : i32
    %72 = vector.broadcast %c1_i32_30 : i32 to vector<8x32xi32>
    %73 = arith.addi %39, %72 : vector<8x32xi32>
    %c8_i32_31 = arith.constant 8 : i32
    %74 = vector.broadcast %c8_i32_31 : i32 to vector<8x32xi32>
    %75 = arith.cmpi slt, %73, %74 : vector<8x32xi32>
    %76 = arith.andi %71, %75 : vector<8x32xi1>
    %c2_i32 = arith.constant 2 : i32
    %77 = vector.broadcast %c2_i32 : i32 to vector<8x32xi32>
    %78 = arith.addi %39, %77 : vector<8x32xi32>
    %c0_i32_32 = arith.constant 0 : i32
    %79 = vector.broadcast %c0_i32_32 : i32 to vector<8x32xi32>
    %80 = arith.cmpi sge, %78, %79 : vector<8x32xi32>
    %c2_i32_33 = arith.constant 2 : i32
    %81 = vector.broadcast %c2_i32_33 : i32 to vector<8x32xi32>
    %82 = arith.addi %39, %81 : vector<8x32xi32>
    %c8_i32_34 = arith.constant 8 : i32
    %83 = vector.broadcast %c8_i32_34 : i32 to vector<8x32xi32>
    %84 = arith.cmpi slt, %82, %83 : vector<8x32xi32>
    %85 = arith.andi %80, %84 : vector<8x32xi1>
    %c0_i32_35 = arith.constant 0 : i32
    %86 = vector.broadcast %c0_i32_35 : i32 to vector<8x32xi32>
    %87 = arith.cmpi sge, %40, %86 : vector<8x32xi32>
    %c8_i32_36 = arith.constant 8 : i32
    %88 = vector.broadcast %c8_i32_36 : i32 to vector<8x32xi32>
    %89 = arith.cmpi slt, %40, %88 : vector<8x32xi32>
    %90 = arith.andi %87, %89 : vector<8x32xi1>
    %c8_i32_37 = arith.constant 8 : i32
    %91 = vector.broadcast %c8_i32_37 : i32 to vector<8x32xi32>
    %92 = arith.cmpi sge, %40, %91 : vector<8x32xi32>
    %c16_i32 = arith.constant 16 : i32
    %93 = vector.broadcast %c16_i32 : i32 to vector<8x32xi32>
    %94 = arith.cmpi slt, %40, %93 : vector<8x32xi32>
    %95 = arith.andi %92, %94 : vector<8x32xi1>
    %c16_i32_38 = arith.constant 16 : i32
    %96 = vector.broadcast %c16_i32_38 : i32 to vector<8x32xi32>
    %97 = arith.cmpi sge, %40, %96 : vector<8x32xi32>
    %c24_i32 = arith.constant 24 : i32
    %98 = vector.broadcast %c24_i32 : i32 to vector<8x32xi32>
    %99 = arith.cmpi slt, %40, %98 : vector<8x32xi32>
    %100 = arith.andi %97, %99 : vector<8x32xi1>
    %c24_i32_39 = arith.constant 24 : i32
    %101 = vector.broadcast %c24_i32_39 : i32 to vector<8x32xi32>
    %102 = arith.cmpi sge, %40, %101 : vector<8x32xi32>
    %c32_i32 = arith.constant 32 : i32
    %103 = vector.broadcast %c32_i32 : i32 to vector<8x32xi32>
    %104 = arith.cmpi slt, %40, %103 : vector<8x32xi32>
    %105 = arith.andi %102, %104 : vector<8x32xi1>
    %106 = vector.extract_strided_slice %36 {offsets = [0, 0], sizes = [8, 32], strides = [1, 1]} : vector<16x32xf32> to vector<8x32xf32>
    %107 = vector.extract_strided_slice %37 {offsets = [0, 0], sizes = [8, 32], strides = [1, 1]} : vector<16x32xf32> to vector<8x32xf32>
    %108 = vector.extract_strided_slice %38 {offsets = [0, 0], sizes = [8, 32], strides = [1, 1]} : vector<16x32xf32> to vector<8x32xf32>
    %109 = vector.extract_strided_slice %2 {offsets = [0, 0], sizes = [8, 1], strides = [1, 1]} : vector<16x1xf32> to vector<8x1xf32>
    %110 = vector.extract_strided_slice %1 {offsets = [0, 0], sizes = [1, 8], strides = [1, 1]} : vector<2x8xf32> to vector<1x8xf32>
    %cst_40 = arith.constant 0.000000e+00 : f32
    %111 = vector.broadcast %cst_40 : f32 to vector<1x8xf32>
    %112 = arith.cmpf oeq, %110, %111 : vector<1x8xf32>
    %113 = vector.broadcast %109 : vector<8x1xf32> to vector<8x32xf32>
    %114 = arith.mulf %108, %113 : vector<8x32xf32>
    %cst_41 = arith.constant 0.000000e+00 : f32
    %115 = vector.broadcast %cst_41 : f32 to vector<8x32xf32>
    %c2_i32_42 = arith.constant 2 : i32
    %116 = tpu.dynamic_rotate %114 by %c2_i32_42 dim 0 : vector<8x32xf32>, i32 -> vector<8x32xf32>
    %cst_43 = arith.constant 0.000000e+00 : f32
    %117 = vector.broadcast %cst_43 : f32 to vector<8x32xf32>
    %118 = arith.select %49, %116, %117 : vector<8x32xi1>, vector<8x32xf32>
    %119 = vector.extract_strided_slice %3 {offsets = [0, 0], sizes = [1, 32], strides = [1, 1]} : vector<5x32xf32> to vector<1x32xf32>
    %120 = vector.broadcast %119 : vector<1x32xf32> to vector<8x32xf32>
    %121 = arith.mulf %118, %120 : vector<8x32xf32>
    %122 = arith.addf %115, %121 : vector<8x32xf32>
    %c1_i32_44 = arith.constant 1 : i32
    %123 = tpu.dynamic_rotate %114 by %c1_i32_44 dim 0 : vector<8x32xf32>, i32 -> vector<8x32xf32>
    %cst_45 = arith.constant 0.000000e+00 : f32
    %124 = vector.broadcast %cst_45 : f32 to vector<8x32xf32>
    %125 = arith.select %58, %123, %124 : vector<8x32xi1>, vector<8x32xf32>
    %126 = vector.extract_strided_slice %3 {offsets = [1, 0], sizes = [1, 32], strides = [1, 1]} : vector<5x32xf32> to vector<1x32xf32>
    %127 = vector.broadcast %126 : vector<1x32xf32> to vector<8x32xf32>
    %128 = arith.mulf %125, %127 : vector<8x32xf32>
    %129 = arith.addf %122, %128 : vector<8x32xf32>
    %cst_46 = arith.constant 0.000000e+00 : f32
    %130 = vector.broadcast %cst_46 : f32 to vector<8x32xf32>
    %131 = arith.select %67, %114, %130 : vector<8x32xi1>, vector<8x32xf32>
    %132 = vector.extract_strided_slice %3 {offsets = [2, 0], sizes = [1, 32], strides = [1, 1]} : vector<5x32xf32> to vector<1x32xf32>
    %133 = vector.broadcast %132 : vector<1x32xf32> to vector<8x32xf32>
    %134 = arith.mulf %131, %133 : vector<8x32xf32>
    %135 = arith.addf %129, %134 : vector<8x32xf32>
    %c7_i32 = arith.constant 7 : i32
    %136 = tpu.dynamic_rotate %114 by %c7_i32 dim 0 : vector<8x32xf32>, i32 -> vector<8x32xf32>
    %cst_47 = arith.constant 0.000000e+00 : f32
    %137 = vector.broadcast %cst_47 : f32 to vector<8x32xf32>
    %138 = arith.select %76, %136, %137 : vector<8x32xi1>, vector<8x32xf32>
    %139 = vector.extract_strided_slice %3 {offsets = [3, 0], sizes = [1, 32], strides = [1, 1]} : vector<5x32xf32> to vector<1x32xf32>
    %140 = vector.broadcast %139 : vector<1x32xf32> to vector<8x32xf32>
    %141 = arith.mulf %138, %140 : vector<8x32xf32>
    %142 = arith.addf %135, %141 : vector<8x32xf32>
    %c6_i32 = arith.constant 6 : i32
    %143 = tpu.dynamic_rotate %114 by %c6_i32 dim 0 : vector<8x32xf32>, i32 -> vector<8x32xf32>
    %cst_48 = arith.constant 0.000000e+00 : f32
    %144 = vector.broadcast %cst_48 : f32 to vector<8x32xf32>
    %145 = arith.select %85, %143, %144 : vector<8x32xi1>, vector<8x32xf32>
    %146 = vector.extract_strided_slice %3 {offsets = [4, 0], sizes = [1, 32], strides = [1, 1]} : vector<5x32xf32> to vector<1x32xf32>
    %147 = vector.broadcast %146 : vector<1x32xf32> to vector<8x32xf32>
    %148 = arith.mulf %145, %147 : vector<8x32xf32>
    %149 = arith.addf %142, %148 : vector<8x32xf32>
    %150 = arith.addf %149, %114 : vector<8x32xf32>
    %151 = vector.broadcast %109 : vector<8x1xf32> to vector<8x32xf32>
    %152 = arith.mulf %150, %151 : vector<8x32xf32>
    %cst_49 = arith.constant 0.000000e+00 : f32
    %153 = vector.broadcast %cst_49 : f32 to vector<8x32xf32>
    %154 = vector.extract_strided_slice %106 {offsets = [0, 0], sizes = [8, 8], strides = [1, 1]} : vector<8x32xf32> to vector<8x8xf32>
    %155 = arith.truncf %154 : vector<8x8xf32> to vector<8x8xbf16>
    %156 = vector.extract_strided_slice %107 {offsets = [0, 0], sizes = [8, 8], strides = [1, 1]} : vector<8x32xf32> to vector<8x8xf32>
    %157 = arith.truncf %156 : vector<8x8xf32> to vector<8x8xbf16>
    %cst_50 = arith.constant dense<0.000000e+00> : vector<8x8xf32>
    %158 = tpu.matmul %155, %157, %cst_50 {dimension_numbers = #tpu.dot_dimension_numbers<[1], [1], [0], [0], [0, 0, 1, 0], [], []>} : vector<8x8xbf16>, vector<8x8xbf16>, vector<8x8xf32> -> vector<8x8xf32>
    %cst_51 = arith.constant -3.40282347E+38 : f32
    %159 = vector.shape_cast %112 : vector<1x8xi1> to vector<1x8xi1>
    %160 = vector.broadcast %159 : vector<1x8xi1> to vector<8x8xi1>
    %161 = vector.broadcast %cst_51 : f32 to vector<8x8xf32>
    %162 = arith.select %160, %161, %158 : vector<8x8xi1>, vector<8x8xf32>
    %cst_52 = arith.constant dense<0xFF800000> : vector<8xf32>
    %163 = vector.multi_reduction <maximumf>, %162, %cst_52 [1] : vector<8x8xf32> to vector<8xf32>
    %164 = vector.shape_cast %163 : vector<8xf32> to vector<8x1xf32>
    %165 = vector.broadcast %164 : vector<8x1xf32> to vector<8x8xf32>
    %166 = arith.subf %162, %165 : vector<8x8xf32>
    %167 = math.exp %166 : vector<8x8xf32>
    %cst_53 = arith.constant dense<0.000000e+00> : vector<8xf32>
    %168 = vector.multi_reduction <add>, %167, %cst_53 [1] : vector<8x8xf32> to vector<8xf32>
    %169 = vector.shape_cast %168 : vector<8xf32> to vector<8x1xf32>
    %170 = tpu.reciprocal %169 {approx = true} : vector<8x1xf32> -> vector<8x1xf32>
    %171 = vector.broadcast %170 : vector<8x1xf32> to vector<8x8xf32>
    %172 = arith.mulf %167, %171 : vector<8x8xf32>
    %cst_54 = arith.constant 0.000000e+00 : f32
    %173 = vector.shape_cast %112 : vector<1x8xi1> to vector<1x8xi1>
    %174 = vector.broadcast %173 : vector<1x8xi1> to vector<8x8xi1>
    %175 = vector.broadcast %cst_54 : f32 to vector<8x8xf32>
    %176 = arith.select %174, %175, %172 : vector<8x8xi1>, vector<8x8xf32>
    %cst_55 = arith.constant 0.000000e+00 : f32
    %177 = vector.broadcast %cst_55 : f32 to vector<8x32xf32>
    %178 = arith.select %90, %108, %177 : vector<8x32xi1>, vector<8x32xf32>
    %179 = arith.truncf %176 : vector<8x8xf32> to vector<8x8xbf16>
    %180 = arith.truncf %178 : vector<8x32xf32> to vector<8x32xbf16>
    %cst_56 = arith.constant dense<0.000000e+00> : vector<8x32xf32>
    %181 = tpu.matmul %179, %180, %cst_56 {dimension_numbers = #tpu.dot_dimension_numbers<[1], [0], [0], [1], [0, 0, 1, 1], [], []>} : vector<8x8xbf16>, vector<8x32xbf16>, vector<8x32xf32> -> vector<8x32xf32>
    %182 = arith.addf %153, %181 : vector<8x32xf32>
    %183 = vector.extract_strided_slice %106 {offsets = [0, 8], sizes = [8, 8], strides = [1, 1]} : vector<8x32xf32> to vector<8x8xf32>
    %184 = arith.truncf %183 : vector<8x8xf32> to vector<8x8xbf16>
    %185 = vector.extract_strided_slice %107 {offsets = [0, 8], sizes = [8, 8], strides = [1, 1]} : vector<8x32xf32> to vector<8x8xf32>
    %186 = arith.truncf %185 : vector<8x8xf32> to vector<8x8xbf16>
    %cst_57 = arith.constant dense<0.000000e+00> : vector<8x8xf32>
    %187 = tpu.matmul %184, %186, %cst_57 {dimension_numbers = #tpu.dot_dimension_numbers<[1], [1], [0], [0], [0, 0, 1, 0], [], []>} : vector<8x8xbf16>, vector<8x8xbf16>, vector<8x8xf32> -> vector<8x8xf32>
    %cst_58 = arith.constant -3.40282347E+38 : f32
    %188 = vector.shape_cast %112 : vector<1x8xi1> to vector<1x8xi1>
    %189 = vector.broadcast %188 : vector<1x8xi1> to vector<8x8xi1>
    %190 = vector.broadcast %cst_58 : f32 to vector<8x8xf32>
    %191 = arith.select %189, %190, %187 : vector<8x8xi1>, vector<8x8xf32>
    %cst_59 = arith.constant dense<0xFF800000> : vector<8xf32>
    %192 = vector.multi_reduction <maximumf>, %191, %cst_59 [1] : vector<8x8xf32> to vector<8xf32>
    %193 = vector.shape_cast %192 : vector<8xf32> to vector<8x1xf32>
    %194 = vector.broadcast %193 : vector<8x1xf32> to vector<8x8xf32>
    %195 = arith.subf %191, %194 : vector<8x8xf32>
    %196 = math.exp %195 : vector<8x8xf32>
    %cst_60 = arith.constant dense<0.000000e+00> : vector<8xf32>
    %197 = vector.multi_reduction <add>, %196, %cst_60 [1] : vector<8x8xf32> to vector<8xf32>
    %198 = vector.shape_cast %197 : vector<8xf32> to vector<8x1xf32>
    %199 = tpu.reciprocal %198 {approx = true} : vector<8x1xf32> -> vector<8x1xf32>
    %200 = vector.broadcast %199 : vector<8x1xf32> to vector<8x8xf32>
    %201 = arith.mulf %196, %200 : vector<8x8xf32>
    %cst_61 = arith.constant 0.000000e+00 : f32
    %202 = vector.shape_cast %112 : vector<1x8xi1> to vector<1x8xi1>
    %203 = vector.broadcast %202 : vector<1x8xi1> to vector<8x8xi1>
    %204 = vector.broadcast %cst_61 : f32 to vector<8x8xf32>
    %205 = arith.select %203, %204, %201 : vector<8x8xi1>, vector<8x8xf32>
    %cst_62 = arith.constant 0.000000e+00 : f32
    %206 = vector.broadcast %cst_62 : f32 to vector<8x32xf32>
    %207 = arith.select %95, %108, %206 : vector<8x32xi1>, vector<8x32xf32>
    %208 = arith.truncf %205 : vector<8x8xf32> to vector<8x8xbf16>
    %209 = arith.truncf %207 : vector<8x32xf32> to vector<8x32xbf16>
    %cst_63 = arith.constant dense<0.000000e+00> : vector<8x32xf32>
    %210 = tpu.matmul %208, %209, %cst_63 {dimension_numbers = #tpu.dot_dimension_numbers<[1], [0], [0], [1], [0, 0, 1, 1], [], []>} : vector<8x8xbf16>, vector<8x32xbf16>, vector<8x32xf32> -> vector<8x32xf32>
    %211 = arith.addf %182, %210 : vector<8x32xf32>
    %212 = vector.extract_strided_slice %106 {offsets = [0, 16], sizes = [8, 8], strides = [1, 1]} : vector<8x32xf32> to vector<8x8xf32>
    %213 = arith.truncf %212 : vector<8x8xf32> to vector<8x8xbf16>
    %214 = vector.extract_strided_slice %107 {offsets = [0, 16], sizes = [8, 8], strides = [1, 1]} : vector<8x32xf32> to vector<8x8xf32>
    %215 = arith.truncf %214 : vector<8x8xf32> to vector<8x8xbf16>
    %cst_64 = arith.constant dense<0.000000e+00> : vector<8x8xf32>
    %216 = tpu.matmul %213, %215, %cst_64 {dimension_numbers = #tpu.dot_dimension_numbers<[1], [1], [0], [0], [0, 0, 1, 0], [], []>} : vector<8x8xbf16>, vector<8x8xbf16>, vector<8x8xf32> -> vector<8x8xf32>
    %cst_65 = arith.constant -3.40282347E+38 : f32
    %217 = vector.shape_cast %112 : vector<1x8xi1> to vector<1x8xi1>
    %218 = vector.broadcast %217 : vector<1x8xi1> to vector<8x8xi1>
    %219 = vector.broadcast %cst_65 : f32 to vector<8x8xf32>
    %220 = arith.select %218, %219, %216 : vector<8x8xi1>, vector<8x8xf32>
    %cst_66 = arith.constant dense<0xFF800000> : vector<8xf32>
    %221 = vector.multi_reduction <maximumf>, %220, %cst_66 [1] : vector<8x8xf32> to vector<8xf32>
    %222 = vector.shape_cast %221 : vector<8xf32> to vector<8x1xf32>
    %223 = vector.broadcast %222 : vector<8x1xf32> to vector<8x8xf32>
    %224 = arith.subf %220, %223 : vector<8x8xf32>
    %225 = math.exp %224 : vector<8x8xf32>
    %cst_67 = arith.constant dense<0.000000e+00> : vector<8xf32>
    %226 = vector.multi_reduction <add>, %225, %cst_67 [1] : vector<8x8xf32> to vector<8xf32>
    %227 = vector.shape_cast %226 : vector<8xf32> to vector<8x1xf32>
    %228 = tpu.reciprocal %227 {approx = true} : vector<8x1xf32> -> vector<8x1xf32>
    %229 = vector.broadcast %228 : vector<8x1xf32> to vector<8x8xf32>
    %230 = arith.mulf %225, %229 : vector<8x8xf32>
    %cst_68 = arith.constant 0.000000e+00 : f32
    %231 = vector.shape_cast %112 : vector<1x8xi1> to vector<1x8xi1>
    %232 = vector.broadcast %231 : vector<1x8xi1> to vector<8x8xi1>
    %233 = vector.broadcast %cst_68 : f32 to vector<8x8xf32>
    %234 = arith.select %232, %233, %230 : vector<8x8xi1>, vector<8x8xf32>
    %cst_69 = arith.constant 0.000000e+00 : f32
    %235 = vector.broadcast %cst_69 : f32 to vector<8x32xf32>
    %236 = arith.select %100, %108, %235 : vector<8x32xi1>, vector<8x32xf32>
    %237 = arith.truncf %234 : vector<8x8xf32> to vector<8x8xbf16>
    %238 = arith.truncf %236 : vector<8x32xf32> to vector<8x32xbf16>
    %cst_70 = arith.constant dense<0.000000e+00> : vector<8x32xf32>
    %239 = tpu.matmul %237, %238, %cst_70 {dimension_numbers = #tpu.dot_dimension_numbers<[1], [0], [0], [1], [0, 0, 1, 1], [], []>} : vector<8x8xbf16>, vector<8x32xbf16>, vector<8x32xf32> -> vector<8x32xf32>
    %240 = arith.addf %211, %239 : vector<8x32xf32>
    %241 = vector.extract_strided_slice %106 {offsets = [0, 24], sizes = [8, 8], strides = [1, 1]} : vector<8x32xf32> to vector<8x8xf32>
    %242 = arith.truncf %241 : vector<8x8xf32> to vector<8x8xbf16>
    %243 = vector.extract_strided_slice %107 {offsets = [0, 24], sizes = [8, 8], strides = [1, 1]} : vector<8x32xf32> to vector<8x8xf32>
    %244 = arith.truncf %243 : vector<8x8xf32> to vector<8x8xbf16>
    %cst_71 = arith.constant dense<0.000000e+00> : vector<8x8xf32>
    %245 = tpu.matmul %242, %244, %cst_71 {dimension_numbers = #tpu.dot_dimension_numbers<[1], [1], [0], [0], [0, 0, 1, 0], [], []>} : vector<8x8xbf16>, vector<8x8xbf16>, vector<8x8xf32> -> vector<8x8xf32>
    %cst_72 = arith.constant -3.40282347E+38 : f32
    %246 = vector.shape_cast %112 : vector<1x8xi1> to vector<1x8xi1>
    %247 = vector.broadcast %246 : vector<1x8xi1> to vector<8x8xi1>
    %248 = vector.broadcast %cst_72 : f32 to vector<8x8xf32>
    %249 = arith.select %247, %248, %245 : vector<8x8xi1>, vector<8x8xf32>
    %cst_73 = arith.constant dense<0xFF800000> : vector<8xf32>
    %250 = vector.multi_reduction <maximumf>, %249, %cst_73 [1] : vector<8x8xf32> to vector<8xf32>
    %251 = vector.shape_cast %250 : vector<8xf32> to vector<8x1xf32>
    %252 = vector.broadcast %251 : vector<8x1xf32> to vector<8x8xf32>
    %253 = arith.subf %249, %252 : vector<8x8xf32>
    %254 = math.exp %253 : vector<8x8xf32>
    %cst_74 = arith.constant dense<0.000000e+00> : vector<8xf32>
    %255 = vector.multi_reduction <add>, %254, %cst_74 [1] : vector<8x8xf32> to vector<8xf32>
    %256 = vector.shape_cast %255 : vector<8xf32> to vector<8x1xf32>
    %257 = tpu.reciprocal %256 {approx = true} : vector<8x1xf32> -> vector<8x1xf32>
    %258 = vector.broadcast %257 : vector<8x1xf32> to vector<8x8xf32>
    %259 = arith.mulf %254, %258 : vector<8x8xf32>
    %cst_75 = arith.constant 0.000000e+00 : f32
    %260 = vector.shape_cast %112 : vector<1x8xi1> to vector<1x8xi1>
    %261 = vector.broadcast %260 : vector<1x8xi1> to vector<8x8xi1>
    %262 = vector.broadcast %cst_75 : f32 to vector<8x8xf32>
    %263 = arith.select %261, %262, %259 : vector<8x8xi1>, vector<8x8xf32>
    %cst_76 = arith.constant 0.000000e+00 : f32
    %264 = vector.broadcast %cst_76 : f32 to vector<8x32xf32>
    %265 = arith.select %105, %108, %264 : vector<8x32xi1>, vector<8x32xf32>
    %266 = arith.truncf %263 : vector<8x8xf32> to vector<8x8xbf16>
    %267 = arith.truncf %265 : vector<8x32xf32> to vector<8x32xbf16>
    %cst_77 = arith.constant dense<0.000000e+00> : vector<8x32xf32>
    %268 = tpu.matmul %266, %267, %cst_77 {dimension_numbers = #tpu.dot_dimension_numbers<[1], [0], [0], [1], [0, 0, 1, 1], [], []>} : vector<8x8xbf16>, vector<8x32xbf16>, vector<8x32xf32> -> vector<8x32xf32>
    %269 = arith.addf %240, %268 : vector<8x32xf32>
    %270 = arith.truncf %269 : vector<8x32xf32> to vector<8x32xbf16>
    %c0_78 = arith.constant 0 : index
    %c0_79 = arith.constant 0 : index
    %271 = vector.load %arg10[%c0_78, %c0_79] : memref<32x32xbf16, #tpu.memory_space<vmem>>, vector<32x32xbf16>
    %cst_80 = arith.constant dense<0.000000e+00> : vector<8x32xf32>
    %272 = tpu.matmul %270, %271, %cst_80 {dimension_numbers = #tpu.dot_dimension_numbers<[1], [0], [0], [1], [0, 0, 1, 1], [], []>} : vector<8x32xbf16>, vector<32x32xbf16>, vector<8x32xf32> -> vector<8x32xf32>
    %c0_81 = arith.constant 0 : index
    %c0_82 = arith.constant 0 : index
    %273 = vector.load %arg11[%c0_81, %c0_82] : memref<1x32xf32, #tpu.memory_space<vmem>>, vector<1x32xf32>
    %274 = vector.broadcast %273 : vector<1x32xf32> to vector<8x32xf32>
    %275 = arith.addf %272, %274 : vector<8x32xf32>
    %276 = vector.extract_strided_slice %0 {offsets = [0, 0], sizes = [8, 32], strides = [1, 1]} : vector<16x32xf32> to vector<8x32xf32>
    %277 = arith.addf %276, %275 : vector<8x32xf32>
    %278 = arith.addf %277, %152 : vector<8x32xf32>
    %c0_83 = arith.constant 0 : index
    %c0_84 = arith.constant 0 : index
    %279 = vector.load %arg16[%c0_83, %c0_84] : memref<16x32xf32, #tpu.memory_space<vmem>>, vector<8x32xf32>
    tpu.vector_store %arg16[%c0_83, %c0_84], %278 {strides = array<i32>} : memref<16x32xf32, #tpu.memory_space<vmem>>, vector<8x32xf32>,
    %280 = vector.extract_strided_slice %36 {offsets = [8, 0], sizes = [8, 32], strides = [1, 1]} : vector<16x32xf32> to vector<8x32xf32>
    %281 = vector.extract_strided_slice %37 {offsets = [8, 0], sizes = [8, 32], strides = [1, 1]} : vector<16x32xf32> to vector<8x32xf32>
    %282 = vector.extract_strided_slice %38 {offsets = [8, 0], sizes = [8, 32], strides = [1, 1]} : vector<16x32xf32> to vector<8x32xf32>
    %283 = vector.extract_strided_slice %2 {offsets = [8, 0], sizes = [8, 1], strides = [1, 1]} : vector<16x1xf32> to vector<8x1xf32>
    %284 = vector.extract_strided_slice %1 {offsets = [1, 0], sizes = [1, 8], strides = [1, 1]} : vector<2x8xf32> to vector<1x8xf32>
    %cst_85 = arith.constant 0.000000e+00 : f32
    %285 = vector.broadcast %cst_85 : f32 to vector<1x8xf32>
    %286 = arith.cmpf oeq, %284, %285 : vector<1x8xf32>
    %287 = vector.broadcast %283 : vector<8x1xf32> to vector<8x32xf32>
    %288 = arith.mulf %282, %287 : vector<8x32xf32>
    %cst_86 = arith.constant 0.000000e+00 : f32
    %289 = vector.broadcast %cst_86 : f32 to vector<8x32xf32>
    %c2_i32_87 = arith.constant 2 : i32
    %290 = tpu.dynamic_rotate %288 by %c2_i32_87 dim 0 : vector<8x32xf32>, i32 -> vector<8x32xf32>
    %cst_88 = arith.constant 0.000000e+00 : f32
    %291 = vector.broadcast %cst_88 : f32 to vector<8x32xf32>
    %292 = arith.select %49, %290, %291 : vector<8x32xi1>, vector<8x32xf32>
    %293 = vector.extract_strided_slice %3 {offsets = [0, 0], sizes = [1, 32], strides = [1, 1]} : vector<5x32xf32> to vector<1x32xf32>
    %294 = vector.broadcast %293 : vector<1x32xf32> to vector<8x32xf32>
    %295 = arith.mulf %292, %294 : vector<8x32xf32>
    %296 = arith.addf %289, %295 : vector<8x32xf32>
    %c1_i32_89 = arith.constant 1 : i32
    %297 = tpu.dynamic_rotate %288 by %c1_i32_89 dim 0 : vector<8x32xf32>, i32 -> vector<8x32xf32>
    %cst_90 = arith.constant 0.000000e+00 : f32
    %298 = vector.broadcast %cst_90 : f32 to vector<8x32xf32>
    %299 = arith.select %58, %297, %298 : vector<8x32xi1>, vector<8x32xf32>
    %300 = vector.extract_strided_slice %3 {offsets = [1, 0], sizes = [1, 32], strides = [1, 1]} : vector<5x32xf32> to vector<1x32xf32>
    %301 = vector.broadcast %300 : vector<1x32xf32> to vector<8x32xf32>
    %302 = arith.mulf %299, %301 : vector<8x32xf32>
    %303 = arith.addf %296, %302 : vector<8x32xf32>
    %cst_91 = arith.constant 0.000000e+00 : f32
    %304 = vector.broadcast %cst_91 : f32 to vector<8x32xf32>
    %305 = arith.select %67, %288, %304 : vector<8x32xi1>, vector<8x32xf32>
    %306 = vector.extract_strided_slice %3 {offsets = [2, 0], sizes = [1, 32], strides = [1, 1]} : vector<5x32xf32> to vector<1x32xf32>
    %307 = vector.broadcast %306 : vector<1x32xf32> to vector<8x32xf32>
    %308 = arith.mulf %305, %307 : vector<8x32xf32>
    %309 = arith.addf %303, %308 : vector<8x32xf32>
    %c7_i32_92 = arith.constant 7 : i32
    %310 = tpu.dynamic_rotate %288 by %c7_i32_92 dim 0 : vector<8x32xf32>, i32 -> vector<8x32xf32>
    %cst_93 = arith.constant 0.000000e+00 : f32
    %311 = vector.broadcast %cst_93 : f32 to vector<8x32xf32>
    %312 = arith.select %76, %310, %311 : vector<8x32xi1>, vector<8x32xf32>
    %313 = vector.extract_strided_slice %3 {offsets = [3, 0], sizes = [1, 32], strides = [1, 1]} : vector<5x32xf32> to vector<1x32xf32>
    %314 = vector.broadcast %313 : vector<1x32xf32> to vector<8x32xf32>
    %315 = arith.mulf %312, %314 : vector<8x32xf32>
    %316 = arith.addf %309, %315 : vector<8x32xf32>
    %c6_i32_94 = arith.constant 6 : i32
    %317 = tpu.dynamic_rotate %288 by %c6_i32_94 dim 0 : vector<8x32xf32>, i32 -> vector<8x32xf32>
    %cst_95 = arith.constant 0.000000e+00 : f32
    %318 = vector.broadcast %cst_95 : f32 to vector<8x32xf32>
    %319 = arith.select %85, %317, %318 : vector<8x32xi1>, vector<8x32xf32>
    %320 = vector.extract_strided_slice %3 {offsets = [4, 0], sizes = [1, 32], strides = [1, 1]} : vector<5x32xf32> to vector<1x32xf32>
    %321 = vector.broadcast %320 : vector<1x32xf32> to vector<8x32xf32>
    %322 = arith.mulf %319, %321 : vector<8x32xf32>
    %323 = arith.addf %316, %322 : vector<8x32xf32>
    %324 = arith.addf %323, %288 : vector<8x32xf32>
    %325 = vector.broadcast %283 : vector<8x1xf32> to vector<8x32xf32>
    %326 = arith.mulf %324, %325 : vector<8x32xf32>
    %cst_96 = arith.constant 0.000000e+00 : f32
    %327 = vector.broadcast %cst_96 : f32 to vector<8x32xf32>
    %328 = vector.extract_strided_slice %280 {offsets = [0, 0], sizes = [8, 8], strides = [1, 1]} : vector<8x32xf32> to vector<8x8xf32>
    %329 = arith.truncf %328 : vector<8x8xf32> to vector<8x8xbf16>
    %330 = vector.extract_strided_slice %281 {offsets = [0, 0], sizes = [8, 8], strides = [1, 1]} : vector<8x32xf32> to vector<8x8xf32>
    %331 = arith.truncf %330 : vector<8x8xf32> to vector<8x8xbf16>
    %cst_97 = arith.constant dense<0.000000e+00> : vector<8x8xf32>
    %332 = tpu.matmul %329, %331, %cst_97 {dimension_numbers = #tpu.dot_dimension_numbers<[1], [1], [0], [0], [0, 0, 1, 0], [], []>} : vector<8x8xbf16>, vector<8x8xbf16>, vector<8x8xf32> -> vector<8x8xf32>
    %cst_98 = arith.constant -3.40282347E+38 : f32
    %333 = vector.shape_cast %286 : vector<1x8xi1> to vector<1x8xi1>
    %334 = vector.broadcast %333 : vector<1x8xi1> to vector<8x8xi1>
    %335 = vector.broadcast %cst_98 : f32 to vector<8x8xf32>
    %336 = arith.select %334, %335, %332 : vector<8x8xi1>, vector<8x8xf32>
    %cst_99 = arith.constant dense<0xFF800000> : vector<8xf32>
    %337 = vector.multi_reduction <maximumf>, %336, %cst_99 [1] : vector<8x8xf32> to vector<8xf32>
    %338 = vector.shape_cast %337 : vector<8xf32> to vector<8x1xf32>
    %339 = vector.broadcast %338 : vector<8x1xf32> to vector<8x8xf32>
    %340 = arith.subf %336, %339 : vector<8x8xf32>
    %341 = math.exp %340 : vector<8x8xf32>
    %cst_100 = arith.constant dense<0.000000e+00> : vector<8xf32>
    %342 = vector.multi_reduction <add>, %341, %cst_100 [1] : vector<8x8xf32> to vector<8xf32>
    %343 = vector.shape_cast %342 : vector<8xf32> to vector<8x1xf32>
    %344 = tpu.reciprocal %343 {approx = true} : vector<8x1xf32> -> vector<8x1xf32>
    %345 = vector.broadcast %344 : vector<8x1xf32> to vector<8x8xf32>
    %346 = arith.mulf %341, %345 : vector<8x8xf32>
    %cst_101 = arith.constant 0.000000e+00 : f32
    %347 = vector.shape_cast %286 : vector<1x8xi1> to vector<1x8xi1>
    %348 = vector.broadcast %347 : vector<1x8xi1> to vector<8x8xi1>
    %349 = vector.broadcast %cst_101 : f32 to vector<8x8xf32>
    %350 = arith.select %348, %349, %346 : vector<8x8xi1>, vector<8x8xf32>
    %cst_102 = arith.constant 0.000000e+00 : f32
    %351 = vector.broadcast %cst_102 : f32 to vector<8x32xf32>
    %352 = arith.select %90, %282, %351 : vector<8x32xi1>, vector<8x32xf32>
    %353 = arith.truncf %350 : vector<8x8xf32> to vector<8x8xbf16>
    %354 = arith.truncf %352 : vector<8x32xf32> to vector<8x32xbf16>
    %cst_103 = arith.constant dense<0.000000e+00> : vector<8x32xf32>
    %355 = tpu.matmul %353, %354, %cst_103 {dimension_numbers = #tpu.dot_dimension_numbers<[1], [0], [0], [1], [0, 0, 1, 1], [], []>} : vector<8x8xbf16>, vector<8x32xbf16>, vector<8x32xf32> -> vector<8x32xf32>
    %356 = arith.addf %327, %355 : vector<8x32xf32>
    %357 = vector.extract_strided_slice %280 {offsets = [0, 8], sizes = [8, 8], strides = [1, 1]} : vector<8x32xf32> to vector<8x8xf32>
    %358 = arith.truncf %357 : vector<8x8xf32> to vector<8x8xbf16>
    %359 = vector.extract_strided_slice %281 {offsets = [0, 8], sizes = [8, 8], strides = [1, 1]} : vector<8x32xf32> to vector<8x8xf32>
    %360 = arith.truncf %359 : vector<8x8xf32> to vector<8x8xbf16>
    %cst_104 = arith.constant dense<0.000000e+00> : vector<8x8xf32>
    %361 = tpu.matmul %358, %360, %cst_104 {dimension_numbers = #tpu.dot_dimension_numbers<[1], [1], [0], [0], [0, 0, 1, 0], [], []>} : vector<8x8xbf16>, vector<8x8xbf16>, vector<8x8xf32> -> vector<8x8xf32>
    %cst_105 = arith.constant -3.40282347E+38 : f32
    %362 = vector.shape_cast %286 : vector<1x8xi1> to vector<1x8xi1>
    %363 = vector.broadcast %362 : vector<1x8xi1> to vector<8x8xi1>
    %364 = vector.broadcast %cst_105 : f32 to vector<8x8xf32>
    %365 = arith.select %363, %364, %361 : vector<8x8xi1>, vector<8x8xf32>
    %cst_106 = arith.constant dense<0xFF800000> : vector<8xf32>
    %366 = vector.multi_reduction <maximumf>, %365, %cst_106 [1] : vector<8x8xf32> to vector<8xf32>
    %367 = vector.shape_cast %366 : vector<8xf32> to vector<8x1xf32>
    %368 = vector.broadcast %367 : vector<8x1xf32> to vector<8x8xf32>
    %369 = arith.subf %365, %368 : vector<8x8xf32>
    %370 = math.exp %369 : vector<8x8xf32>
    %cst_107 = arith.constant dense<0.000000e+00> : vector<8xf32>
    %371 = vector.multi_reduction <add>, %370, %cst_107 [1] : vector<8x8xf32> to vector<8xf32>
    %372 = vector.shape_cast %371 : vector<8xf32> to vector<8x1xf32>
    %373 = tpu.reciprocal %372 {approx = true} : vector<8x1xf32> -> vector<8x1xf32>
    %374 = vector.broadcast %373 : vector<8x1xf32> to vector<8x8xf32>
    %375 = arith.mulf %370, %374 : vector<8x8xf32>
    %cst_108 = arith.constant 0.000000e+00 : f32
    %376 = vector.shape_cast %286 : vector<1x8xi1> to vector<1x8xi1>
    %377 = vector.broadcast %376 : vector<1x8xi1> to vector<8x8xi1>
    %378 = vector.broadcast %cst_108 : f32 to vector<8x8xf32>
    %379 = arith.select %377, %378, %375 : vector<8x8xi1>, vector<8x8xf32>
    %cst_109 = arith.constant 0.000000e+00 : f32
    %380 = vector.broadcast %cst_109 : f32 to vector<8x32xf32>
    %381 = arith.select %95, %282, %380 : vector<8x32xi1>, vector<8x32xf32>
    %382 = arith.truncf %379 : vector<8x8xf32> to vector<8x8xbf16>
    %383 = arith.truncf %381 : vector<8x32xf32> to vector<8x32xbf16>
    %cst_110 = arith.constant dense<0.000000e+00> : vector<8x32xf32>
    %384 = tpu.matmul %382, %383, %cst_110 {dimension_numbers = #tpu.dot_dimension_numbers<[1], [0], [0], [1], [0, 0, 1, 1], [], []>} : vector<8x8xbf16>, vector<8x32xbf16>, vector<8x32xf32> -> vector<8x32xf32>
    %385 = arith.addf %356, %384 : vector<8x32xf32>
    %386 = vector.extract_strided_slice %280 {offsets = [0, 16], sizes = [8, 8], strides = [1, 1]} : vector<8x32xf32> to vector<8x8xf32>
    %387 = arith.truncf %386 : vector<8x8xf32> to vector<8x8xbf16>
    %388 = vector.extract_strided_slice %281 {offsets = [0, 16], sizes = [8, 8], strides = [1, 1]} : vector<8x32xf32> to vector<8x8xf32>
    %389 = arith.truncf %388 : vector<8x8xf32> to vector<8x8xbf16>
    %cst_111 = arith.constant dense<0.000000e+00> : vector<8x8xf32>
    %390 = tpu.matmul %387, %389, %cst_111 {dimension_numbers = #tpu.dot_dimension_numbers<[1], [1], [0], [0], [0, 0, 1, 0], [], []>} : vector<8x8xbf16>, vector<8x8xbf16>, vector<8x8xf32> -> vector<8x8xf32>
    %cst_112 = arith.constant -3.40282347E+38 : f32
    %391 = vector.shape_cast %286 : vector<1x8xi1> to vector<1x8xi1>
    %392 = vector.broadcast %391 : vector<1x8xi1> to vector<8x8xi1>
    %393 = vector.broadcast %cst_112 : f32 to vector<8x8xf32>
    %394 = arith.select %392, %393, %390 : vector<8x8xi1>, vector<8x8xf32>
    %cst_113 = arith.constant dense<0xFF800000> : vector<8xf32>
    %395 = vector.multi_reduction <maximumf>, %394, %cst_113 [1] : vector<8x8xf32> to vector<8xf32>
    %396 = vector.shape_cast %395 : vector<8xf32> to vector<8x1xf32>
    %397 = vector.broadcast %396 : vector<8x1xf32> to vector<8x8xf32>
    %398 = arith.subf %394, %397 : vector<8x8xf32>
    %399 = math.exp %398 : vector<8x8xf32>
    %cst_114 = arith.constant dense<0.000000e+00> : vector<8xf32>
    %400 = vector.multi_reduction <add>, %399, %cst_114 [1] : vector<8x8xf32> to vector<8xf32>
    %401 = vector.shape_cast %400 : vector<8xf32> to vector<8x1xf32>
    %402 = tpu.reciprocal %401 {approx = true} : vector<8x1xf32> -> vector<8x1xf32>
    %403 = vector.broadcast %402 : vector<8x1xf32> to vector<8x8xf32>
    %404 = arith.mulf %399, %403 : vector<8x8xf32>
    %cst_115 = arith.constant 0.000000e+00 : f32
    %405 = vector.shape_cast %286 : vector<1x8xi1> to vector<1x8xi1>
    %406 = vector.broadcast %405 : vector<1x8xi1> to vector<8x8xi1>
    %407 = vector.broadcast %cst_115 : f32 to vector<8x8xf32>
    %408 = arith.select %406, %407, %404 : vector<8x8xi1>, vector<8x8xf32>
    %cst_116 = arith.constant 0.000000e+00 : f32
    %409 = vector.broadcast %cst_116 : f32 to vector<8x32xf32>
    %410 = arith.select %100, %282, %409 : vector<8x32xi1>, vector<8x32xf32>
    %411 = arith.truncf %408 : vector<8x8xf32> to vector<8x8xbf16>
    %412 = arith.truncf %410 : vector<8x32xf32> to vector<8x32xbf16>
    %cst_117 = arith.constant dense<0.000000e+00> : vector<8x32xf32>
    %413 = tpu.matmul %411, %412, %cst_117 {dimension_numbers = #tpu.dot_dimension_numbers<[1], [0], [0], [1], [0, 0, 1, 1], [], []>} : vector<8x8xbf16>, vector<8x32xbf16>, vector<8x32xf32> -> vector<8x32xf32>
    %414 = arith.addf %385, %413 : vector<8x32xf32>
    %415 = vector.extract_strided_slice %280 {offsets = [0, 24], sizes = [8, 8], strides = [1, 1]} : vector<8x32xf32> to vector<8x8xf32>
    %416 = arith.truncf %415 : vector<8x8xf32> to vector<8x8xbf16>
    %417 = vector.extract_strided_slice %281 {offsets = [0, 24], sizes = [8, 8], strides = [1, 1]} : vector<8x32xf32> to vector<8x8xf32>
    %418 = arith.truncf %417 : vector<8x8xf32> to vector<8x8xbf16>
    %cst_118 = arith.constant dense<0.000000e+00> : vector<8x8xf32>
    %419 = tpu.matmul %416, %418, %cst_118 {dimension_numbers = #tpu.dot_dimension_numbers<[1], [1], [0], [0], [0, 0, 1, 0], [], []>} : vector<8x8xbf16>, vector<8x8xbf16>, vector<8x8xf32> -> vector<8x8xf32>
    %cst_119 = arith.constant -3.40282347E+38 : f32
    %420 = vector.shape_cast %286 : vector<1x8xi1> to vector<1x8xi1>
    %421 = vector.broadcast %420 : vector<1x8xi1> to vector<8x8xi1>
    %422 = vector.broadcast %cst_119 : f32 to vector<8x8xf32>
    %423 = arith.select %421, %422, %419 : vector<8x8xi1>, vector<8x8xf32>
    %cst_120 = arith.constant dense<0xFF800000> : vector<8xf32>
    %424 = vector.multi_reduction <maximumf>, %423, %cst_120 [1] : vector<8x8xf32> to vector<8xf32>
    %425 = vector.shape_cast %424 : vector<8xf32> to vector<8x1xf32>
    %426 = vector.broadcast %425 : vector<8x1xf32> to vector<8x8xf32>
    %427 = arith.subf %423, %426 : vector<8x8xf32>
    %428 = math.exp %427 : vector<8x8xf32>
    %cst_121 = arith.constant dense<0.000000e+00> : vector<8xf32>
    %429 = vector.multi_reduction <add>, %428, %cst_121 [1] : vector<8x8xf32> to vector<8xf32>
    %430 = vector.shape_cast %429 : vector<8xf32> to vector<8x1xf32>
    %431 = tpu.reciprocal %430 {approx = true} : vector<8x1xf32> -> vector<8x1xf32>
    %432 = vector.broadcast %431 : vector<8x1xf32> to vector<8x8xf32>
    %433 = arith.mulf %428, %432 : vector<8x8xf32>
    %cst_122 = arith.constant 0.000000e+00 : f32
    %434 = vector.shape_cast %286 : vector<1x8xi1> to vector<1x8xi1>
    %435 = vector.broadcast %434 : vector<1x8xi1> to vector<8x8xi1>
    %436 = vector.broadcast %cst_122 : f32 to vector<8x8xf32>
    %437 = arith.select %435, %436, %433 : vector<8x8xi1>, vector<8x8xf32>
    %cst_123 = arith.constant 0.000000e+00 : f32
    %438 = vector.broadcast %cst_123 : f32 to vector<8x32xf32>
    %439 = arith.select %105, %282, %438 : vector<8x32xi1>, vector<8x32xf32>
    %440 = arith.truncf %437 : vector<8x8xf32> to vector<8x8xbf16>
    %441 = arith.truncf %439 : vector<8x32xf32> to vector<8x32xbf16>
    %cst_124 = arith.constant dense<0.000000e+00> : vector<8x32xf32>
    %442 = tpu.matmul %440, %441, %cst_124 {dimension_numbers = #tpu.dot_dimension_numbers<[1], [0], [0], [1], [0, 0, 1, 1], [], []>} : vector<8x8xbf16>, vector<8x32xbf16>, vector<8x32xf32> -> vector<8x32xf32>
    %443 = arith.addf %414, %442 : vector<8x32xf32>
    %444 = arith.truncf %443 : vector<8x32xf32> to vector<8x32xbf16>
    %c0_125 = arith.constant 0 : index
    %c0_126 = arith.constant 0 : index
    %445 = vector.load %arg10[%c0_125, %c0_126] : memref<32x32xbf16, #tpu.memory_space<vmem>>, vector<32x32xbf16>
    %cst_127 = arith.constant dense<0.000000e+00> : vector<8x32xf32>
    %446 = tpu.matmul %444, %445, %cst_127 {dimension_numbers = #tpu.dot_dimension_numbers<[1], [0], [0], [1], [0, 0, 1, 1], [], []>} : vector<8x32xbf16>, vector<32x32xbf16>, vector<8x32xf32> -> vector<8x32xf32>
    %c0_128 = arith.constant 0 : index
    %c0_129 = arith.constant 0 : index
    %447 = vector.load %arg11[%c0_128, %c0_129] : memref<1x32xf32, #tpu.memory_space<vmem>>, vector<1x32xf32>
    %448 = vector.broadcast %447 : vector<1x32xf32> to vector<8x32xf32>
    %449 = arith.addf %446, %448 : vector<8x32xf32>
    %450 = vector.extract_strided_slice %0 {offsets = [8, 0], sizes = [8, 32], strides = [1, 1]} : vector<16x32xf32> to vector<8x32xf32>
    %451 = arith.addf %450, %449 : vector<8x32xf32>
    %452 = arith.addf %451, %326 : vector<8x32xf32>
    %c8 = arith.constant 8 : index
    %c0_130 = arith.constant 0 : index
    %453 = vector.load %arg16[%c8, %c0_130] : memref<16x32xf32, #tpu.memory_space<vmem>>, vector<8x32xf32>
    tpu.vector_store %arg16[%c8, %c0_130], %452 {strides = array<i32>} : memref<16x32xf32, #tpu.memory_space<vmem>>, vector<8x32xf32>,
    %c0_131 = arith.constant 0 : index
    %c0_132 = arith.constant 0 : index
    %454 = vector.load %arg16[%c0_131, %c0_132] : memref<16x32xf32, #tpu.memory_space<vmem>>, vector<16x32xf32>
    %c0_133 = arith.constant 0 : index
    %c0_134 = arith.constant 0 : index
    %455 = vector.load %arg5[%c0_133, %c0_134] : memref<1x32xf32, #tpu.memory_space<vmem>>, vector<1x32xf32>
    %c0_135 = arith.constant 0 : index
    %c0_136 = arith.constant 0 : index
    %456 = vector.load %arg6[%c0_135, %c0_136] : memref<1x32xf32, #tpu.memory_space<vmem>>, vector<1x32xf32>
    %cst_137 = arith.constant dense<0.000000e+00> : vector<16xf32>
    %457 = vector.multi_reduction <add>, %454, %cst_137 [1] : vector<16x32xf32> to vector<16xf32>
    %458 = vector.shape_cast %457 : vector<16xf32> to vector<16x1xf32>
    %cst_138 = arith.constant 3.200000e+01 : f32
    %459 = vector.broadcast %cst_138 : f32 to vector<16x1xf32>
    %460 = arith.divf %458, %459 : vector<16x1xf32>
    %461 = vector.broadcast %460 : vector<16x1xf32> to vector<16x32xf32>
    %462 = arith.subf %454, %461 : vector<16x32xf32>
    %463 = arith.mulf %462, %462 : vector<16x32xf32>
    %cst_139 = arith.constant dense<0.000000e+00> : vector<16xf32>
    %464 = vector.multi_reduction <add>, %463, %cst_139 [1] : vector<16x32xf32> to vector<16xf32>
    %465 = vector.shape_cast %464 : vector<16xf32> to vector<16x1xf32>
    %cst_140 = arith.constant 3.200000e+01 : f32
    %466 = vector.broadcast %cst_140 : f32 to vector<16x1xf32>
    %467 = arith.divf %465, %466 : vector<16x1xf32>
    %468 = vector.broadcast %460 : vector<16x1xf32> to vector<16x32xf32>
    %469 = arith.subf %454, %468 : vector<16x32xf32>
    %cst_141 = arith.constant 9.99999996E-13 : f32
    %470 = vector.broadcast %cst_141 : f32 to vector<16x1xf32>
    %471 = arith.addf %467, %470 : vector<16x1xf32>
    %472 = math.rsqrt %471 : vector<16x1xf32>
    %473 = vector.broadcast %472 : vector<16x1xf32> to vector<16x32xf32>
    %474 = arith.mulf %469, %473 : vector<16x32xf32>
    %475 = vector.broadcast %455 : vector<1x32xf32> to vector<16x32xf32>
    %476 = arith.mulf %474, %475 : vector<16x32xf32>
    %477 = vector.broadcast %456 : vector<1x32xf32> to vector<16x32xf32>
    %478 = arith.addf %476, %477 : vector<16x32xf32>
    %479 = arith.truncf %478 : vector<16x32xf32> to vector<16x32xbf16>
    %c0_142 = arith.constant 0 : index
    %c0_143 = arith.constant 0 : index
    %480 = vector.load %arg12[%c0_142, %c0_143] : memref<32x64xbf16, #tpu.memory_space<vmem>>, vector<32x64xbf16>
    %cst_144 = arith.constant dense<0.000000e+00> : vector<16x64xf32>
    %481 = tpu.matmul %479, %480, %cst_144 {dimension_numbers = #tpu.dot_dimension_numbers<[1], [0], [0], [1], [0, 0, 1, 1], [], []>} : vector<16x32xbf16>, vector<32x64xbf16>, vector<16x64xf32> -> vector<16x64xf32>
    %c0_145 = arith.constant 0 : index
    %c0_146 = arith.constant 0 : index
    %482 = vector.load %arg13[%c0_145, %c0_146] : memref<1x64xf32, #tpu.memory_space<vmem>>, vector<1x64xf32>
    %483 = vector.broadcast %482 : vector<1x64xf32> to vector<16x64xf32>
    %484 = arith.addf %481, %483 : vector<16x64xf32>
    %cst_147 = arith.constant 0.000000e+00 : f32
    %485 = vector.broadcast %cst_147 : f32 to vector<16x64xf32>
    %486 = arith.maximumf %484, %485 : vector<16x64xf32>
    %487 = arith.truncf %486 : vector<16x64xf32> to vector<16x64xbf16>
    %c0_148 = arith.constant 0 : index
    %c0_149 = arith.constant 0 : index
    %488 = vector.load %arg14[%c0_148, %c0_149] : memref<64x32xbf16, #tpu.memory_space<vmem>>, vector<64x32xbf16>
    %cst_150 = arith.constant dense<0.000000e+00> : vector<16x32xf32>
    %489 = tpu.matmul %487, %488, %cst_150 {dimension_numbers = #tpu.dot_dimension_numbers<[1], [0], [0], [1], [0, 0, 1, 1], [], []>} : vector<16x64xbf16>, vector<64x32xbf16>, vector<16x32xf32> -> vector<16x32xf32>
    %c0_151 = arith.constant 0 : index
    %c0_152 = arith.constant 0 : index
    %490 = vector.load %arg15[%c0_151, %c0_152] : memref<1x32xf32, #tpu.memory_space<vmem>>, vector<1x32xf32>
    %491 = vector.broadcast %490 : vector<1x32xf32> to vector<16x32xf32>
    %492 = arith.addf %489, %491 : vector<16x32xf32>
    %493 = arith.addf %454, %492 : vector<16x32xf32>
    %c0_153 = arith.constant 0 : index
    %c0_154 = arith.constant 0 : index
    %494 = vector.load %arg16[%c0_153, %c0_154] : memref<16x32xf32, #tpu.memory_space<vmem>>, vector<16x32xf32>
    tpu.vector_store %arg16[%c0_153, %c0_154], %493 {strides = array<i32>} : memref<16x32xf32, #tpu.memory_space<vmem>>, vector<16x32xf32>,
    return
  }
}

</mosaic_0001>

<bundles_post_ra>
// kernel: encoder_layer_sanm.1
= control target key start
LH: loop header
LB: loop body
LE: loop exit
PB: predicated region body
PF: predicated region fallthrough
CT: control target
= control target key end

     0   :  { %s1642_s0 = inlined_call_operand.vmem [shape: f32[16,32], index: 0, kind: input, shape index: {}]   ;;  %s1643_s1 = inlined_call_operand.vmem [shape: f32[2,8], index: 1, kind: input, shape index: {}]   ;;  %s1644_s2 = inlined_call_operand.vmem [shape: f32[16,1], index: 2, kind: input, shape index: {}]   ;;  %s1645_s3 = inlined_call_operand.vmem [shape: f32[1,32], index: 3, kind: input, shape index: {}]   ;;  %s1646_s4 = inlined_call_operand.vmem [shape: f32[1,32], index: 4, kind: input, shape index: {}]   ;;  %s1647_s5 = inlined_call_operand.vmem [shape: f32[1,32], index: 5, kind: input, shape index: {}]   ;;  %s1648_s6 = inlined_call_operand.vmem [shape: f32[1,32], index: 6, kind: input, shape index: {}]   ;;  %s1649_s7 = inlined_call_operand.vmem [shape: bf16[32,96], index: 7, kind: input, shape index: {}]   ;;  %s1650_s8 = inlined_call_operand.vmem [shape: f32[1,96], index: 8, kind: input, shape index: {}]   ;;  %s1651_s9 = inlined_call_operand.vmem [shape: f32[5,32], index: 9, kind: input, shape index: {}]   ;;  %s1652_s10 = inlined_call_operand.vmem [shape: bf16[32,32], index: 10, kind: input, shape index: {}]   ;;  %s1653_s11 = inlined_call_operand.vmem [shape: f32[1,32], index: 11, kind: input, shape index: {}]   ;;  %s1654_s12 = inlined_call_operand.vmem [shape: bf16[32,64], index: 12, kind: input, shape index: {}]   ;;  %s1655_s13 = inlined_call_operand.vmem [shape: f32[1,64], index: 13, kind: input, shape index: {}]   ;;  %s1656_s14 = inlined_call_operand.vmem [shape: bf16[64,32], index: 14, kind: input, shape index: {}]   ;;  %s1657_s15 = inlined_call_operand.vmem [shape: f32[1,32], index: 15, kind: input, shape index: {}]   ;;  %s1658_s16 = inlined_call_operand.hbm [shape: f32[16,32], index: 16, kind: output, shape index: {}]  }
   0x1   :  { %1660 = sst [smem:[#allocation5_spill]] %s1642_s0 }
   0x2   :  { %s1661_s23 = sld [smem:[#allocation5_spill]]  ;;  %vm63_vm0 = vcmask 261120  }
   0x8   :  { %v1296_v0 = vld [vmem:[%s1661_s23] sm:$0xff]  ;;  %v1303_v2 = vld [vmem:[%s1661_s23 + $0x8] sm:$0xff] }
   0x9   :  { %v64_v1 = vsel %vm63_vm0, %v1296_v0, 0.0 }
   0xa   :  { %65 = vadd.xlane.f32.xlu0 %v64_v1 }
   0xb   :  { %21 = vsyncpa [#allocation3], 0  ;;  %v67_v3 = vsel %vm63_vm0, %v1303_v2, 0.0  ;;  %v1195_v4 = vmov 32.0   ;;  %v1092_v21 = vld [vmem:[%s1649_s7 + $0x8] sm:$0xff]  ;;  %v1091_v23 = vld [vmem:[%s1649_s7] sm:$0xff] }
   0xc   :  { %1127 = vrcp.f32 %v1195_v4  ;;  %155 = vmatpush.bf16.msra.mxu0 %v1092_v21  ;;  %v1118_v42 = vld [vmem:[%s1645_s3] ss:$0 sm:$0xff]  ;;  %s1196_s3 = smov 72   ;;  %s1198_s20 = smov 88   ;;  %vm250_vm8 = vcmask 64512  }
   0xd   :  { %v1119_v47 = vld [vmem:[%s1646_s4] ss:$0 sm:$0xff]  ;;  %s1197_s4 = smov 96   ;;  %s1200_s21 = smov 80  }
   0xe   :  { %v1120_v52 = vld [vmem:[%s1650_s8] ss:$0 sm:$0xff]  ;;  %s1199_s8 = smov 120   ;;  %s1201_s22 = smov 104  }
   0xf   :  { %s1202_s23 = smov 112  }
  0x10   :  { %156 = vmatpush.bf16.msra.mxu0 %v1091_v23 }
  0x12   :  { %68 = vadd.xlane.f32.xlu0 %v67_v3  ;;  %v1128_v5 = vpop.eup %1127 }
  0x13   :  { %v71_v6 = vmul.f32 32.0, %v1128_v5  ;;  %vm75_vm1 = vweird.f32 %v1128_v5 }
  0x15   :  { %v72_v7 = vsub.f32 1.0, %v71_v6  ;;  %v1203_v6 = vmov 0  }
  0x16   :  { %1116 = vset.pattern.permute.xlu2 %v1203_v6  ;;  %1117 = vset.pattern.permute.xlu0 %v1203_v6 }
  0x17   :  { %v73_v8 = vmul.f32 %v1128_v5, %v72_v7 }
  0x19   :  { %v74_v9 = vadd.f32 %v1128_v5, %v73_v8 }
  0x1b   :  { %v1307_v10 = vsel %vm75_vm1, %v1128_v5, %v74_v9 }
  0x7d   :  { %v66_v11 = vpop.xlane.xlu0 %65 }
  0x7e   :  { %v77_v12 = vmul.f32 %v1307_v10, %v66_v11 }
  0x80   :  { %v79_v13 = vsub.f32 %v1296_v0, %v77_v12 }
  0x82   :  { %v81_v14 = vmul.f32 %v79_v13, %v79_v13 }
  0x84   :  { %v83_v15 = vsel %vm63_vm0, %v81_v14, 0.0 }
  0x85   :  { %84 = vadd.xlane.f32.xlu1 %v83_v15  ;;  %v69_v16 = vpop.xlane.xlu0 %68 }
  0x86   :  { %v78_v17 = vmul.f32 %v1307_v10, %v69_v16 }
  0x88   :  { %v80_v18 = vsub.f32 %v1303_v2, %v78_v17  ;;  %v57_v17 = vld [vmem:[%s1643_s1] sm:$0x3]  ;;  %s1204_s1 = smov 64  }
  0x89   :  { %vm200_vm9 = vcmp.eq.f32.partialorder %v57_v17, 0.0 }
  0x8a   :  { %v82_v19 = vmul.f32 %v80_v18, %v80_v18 }
  0x8c   :  { %v86_v20 = vsel %vm63_vm0, %v82_v19, 0.0 }
  0x8d   :  { %87 = vadd.xlane.f32.xlu1 %v86_v20 }
  0xf8   :  { %v85_v22 = vpop.xlane.xlu1 %84 }
  0xf9   :  { %v89_v24 = vmul.f32 %v85_v22, %v1307_v10 }
  0xfb   :  { %v91_v25 = vadd.f32 1e-12, %v89_v24 }
  0xfd   :  { %1129 = vrsqrt.f32 %v91_v25  ;;  %vm99_vm3 = vweird.f32 %v91_v25 }
 0x100   :  { %v88_v26 = vpop.xlane.xlu1 %87 }
 0x101   :  { %v90_v27 = vmul.f32 %v88_v26, %v1307_v10 }
 0x103   :  { %v1130_v28 = vpop.eup %1129  ;;  %v92_v29 = vadd.f32 1e-12, %v90_v27 }
 0x104   :  { %v94_v30 = vmul.f32 %v1130_v28, %v91_v25  ;;  %vm100_vm2 = vweird.f32 %v1130_v28 }
 0x105   :  { %1131 = vrsqrt.f32 %v92_v29  ;;  %vm101_vm4 = vmor %vm99_vm3, %vm100_vm2  ;;  %vm109_vm6 = vweird.f32 %v92_v29 }
 0x106   :  { %v95_v31 = vmul.f32 %v1130_v28, %v94_v30 }
 0x108   :  { %v96_v32 = vmul.f32 0.5, %v95_v31 }
 0x10a   :  { %v97_v33 = vsub.f32 1.5, %v96_v32 }
 0x10b   :  { %v1132_v34 = vpop.eup %1131 }
 0x10c   :  { %v98_v35 = vmul.f32 %v1130_v28, %v97_v33  ;;  %v104_v36 = vmul.f32 %v1132_v34, %v92_v29  ;;  %vm110_vm5 = vweird.f32 %v1132_v34 }
 0x10d   :  { %vm111_vm7 = vmor %vm109_vm6, %vm110_vm5 }
 0x10e   :  { %v105_v37 = vmul.f32 %v1132_v34, %v104_v36  ;;  %v102_v38 = vsel %vm101_vm4, %v1130_v28, %v98_v35  ;;  %vm336_vm4 = vcmask 1043456  }
 0x10f   :  { %v113_v41 = vmul.f32 %v102_v38, %v79_v13 }
 0x110   :  { %v106_v39 = vmul.f32 0.5, %v105_v37 }
 0x111   :  { %v118_v46 = vmul.f32 %v1118_v42, %v113_v41 }
 0x112   :  { %v107_v40 = vsub.f32 1.5, %v106_v39 }
 0x113   :  { %v123_v49 = vadd.f32 %v1119_v47, %v118_v46 }
 0x114   :  { %v108_v43 = vmul.f32 %v1132_v34, %v107_v40 }
 0x116   :  { %v112_v44 = vsel %vm111_vm7, %v1132_v34, %v108_v43 }
 0x117   :  { %v114_v45 = vmul.f32 %v112_v44, %v80_v18  ;;  %v270_v18 = vsel %vm200_vm9, 1, %v1203_v6 }
 0x118   :  { %v271_v19 = vperm.slane %v270_v18, 0  ;;  %v589_v37 = vperm.slane %v270_v18, 1 }
 0x119   :  { %v119_v48 = vmul.f32 %v1118_v42, %v114_v45 }
 0x11a   :  { %vm1367_vm10 = vcmp.eq.s32.totalorder %v271_v19, 1  ;;  %vm1383_vm11 = vcmp.eq.s32.totalorder %v589_v37, 1  ;;  %v1093_v37 = vld [vmem:[%s1652_s10] sm:$0xff] }
 0x11b   :  { %v124_v50 = vadd.f32 %v1119_v47, %v119_v48 }
 0x11d   :  { %v125_v51 = vpack.c.bf16 %v124_v50, %v123_v49 }
 0x11f   :  { %1030 = vmatmul.msk.bf16.vlgmr.msra.gmra.mxu0 %vm63_vm0, %v125_v51 }
 0x19c   :  { %v158_v53 = vpop.f32.mrf.mxu0 }
 0x19d   :  { %v1333_v54 = vadd.f32 %v1120_v52, %v158_v53 }
 0x19f   :  { %v246_v55 = vpack.c.bf16 %v1333_v54, %v1333_v54  ;;  %v163_v57 = vmul.f32 0.35355338, %v1333_v54 }
 0x1a1   :  { %433 = vrot.lane.b32.xlu1 %v246_v55, %s1196_s3  ;;  %248 = vrot.lane.b32.xlu0 %v246_v55, %s1197_s4  ;;  %v245_v60 = vpack.c.bf16 %v163_v57, %v163_v57 }
 0x1a2   :  { %296 = vrot.lane.b32.xlu2 %v246_v55, %s1198_s20 }
 0x1a4   :  { %v160_v56 = vpop.f32.mrf.mxu0 }
 0x1a5   :  { %v1340_v58 = vadd.f32 %v1120_v52, %v160_v56 }
 0x1a7   :  { %v1344_v59 = vpack.c.bf16 %v1340_v58, %v1340_v58  ;;  %v164_v61 = vmul.f32 0.35355338, %v1340_v58 }
 0x1a9   :  { %614 = vrot.lane.b32.xlu0 %v1344_v59, %s1198_s20  ;;  %v1351_v62 = vpack.c.bf16 %v164_v61, %v164_v61  ;;  %s1207_s20 = smov 8  }
 0x1aa   :  { %294 = vrot.lane.b32.xlu2 %v245_v60, %s1199_s8 }
 0x1b2   :  { %374 = vrot.lane.b32.xlu2 %v246_v55, %s1200_s21 }
 0x1ba   :  { %431 = vrot.lane.b32.xlu2 %v245_v60, %s1201_s22 }
 0x1c2   :  { %372 = vrot.lane.b32.xlu2 %v245_v60, %s1202_s23 }
 0x1ca   :  { %612 = vrot.lane.b32.xlu2 %v1351_v62, %s1199_s8 }
 0x1fc   :  { %v297_v63 = vpop.permute.xlu2 %296 }
 0x1fd   :  { %v302_v1 = vsel %vm250_vm8, %v297_v63, 0 }
 0x1fe   :  { %311 = vmatpush.bf16.xpose.msra.mxu2 %v302_v1 }
 0x204   :  { %v295_v3 = vpop.permute.xlu2 %294 }
 0x205   :  { %1032 = vmatmul.msk.bf16.vlgmr.msra.gmra.mxu2 %vm250_vm8, %v295_v3  ;;  %v165_v3 = vlaneseq }
 0x207   :  { %v1415_v6 = vand.u32 127, %v165_v3 }
 0x209   :  { %vm191_vm12 = vcmp.ge.s32.totalorder %v1415_v6, 8  ;;  %vm192_vm13 = vcmp.lt.s32.totalorder %v1415_v6, 16  ;;  %vm194_vm14 = vcmp.ge.s32.totalorder %v1415_v6, 16  ;;  %vm195_vm15 = vcmp.lt.s32.totalorder %v1415_v6, 24 }
 0x20a   :  { %vm1421_vm1 = vmand %vm191_vm12, %vm192_vm13  ;;  %vm189_vm3 = vcmp.lt.s32.totalorder %v1415_v6, 8  ;;  %vm197_vm5 = vcmp.ge.s32.totalorder %v1415_v6, 24  ;;  %vm198_vm6 = vcmp.lt.s32.totalorder %v1415_v6, 32 }
 0x20b   :  { %vm1425_vm2 = vmand %vm194_vm14, %vm195_vm15 }
 0x20c   :  { %v375_v4 = vpop.permute.xlu2 %374  ;;  %vm1451_vm7 = vmand %vm197_vm5, %vm198_vm6 }
 0x20d   :  { %v380_v5 = vsel %vm250_vm8, %v375_v4, 0 }
 0x20e   :  { %389 = vmatpush.bf16.xpose.msrb.mxu0 %v380_v5 }
 0x213   :  { %v434_v7 = vpop.permute.xlu1 %433  ;;  %v249_v8 = vpop.permute.xlu0 %248 }
 0x214   :  { %v432_v9 = vpop.permute.xlu2 %431  ;;  %v255_v11 = vsel %vm250_vm8, %v249_v8, 0  ;;  %v439_v12 = vsel %vm250_vm8, %v434_v7, 0 }
 0x215   :  { %264 = vmatpush.bf16.xpose.msra.mxu1 %v255_v11  ;;  %448 = vmatpush.bf16.xpose.msrb.mxu2 %v439_v12 }
 0x21b   :  { %v615_v13 = vpop.permute.xlu0 %614 }
 0x21c   :  { %v620_v14 = vsel %vm250_vm8, %v615_v13, 0  ;;  %v373_v15 = vpop.permute.xlu2 %372  ;;  %1031 = vmatmul.msk.bf16.vlgmr.msra.gmra.mxu1 %vm250_vm8, %v245_v60  ;;  %1037 = vmatmul.msk.bf16.vlgmr.msrb.gmra.mxu2 %vm250_vm8, %v432_v9 }
 0x21d   :  { %1035 = vmatmul.msk.bf16.vlgmr.msrb.gmra.mxu0 %vm250_vm8, %v373_v15  ;;  %629 = vmatpush.bf16.xpose.msra.mxu2 %v620_v14 }
 0x224   :  { %v613_v16 = vpop.permute.xlu2 %612 }
 0x22c   :  { %1049 = vmatmul.msk.bf16.vlgmr.msra.gmra.mxu2 %vm250_vm8, %v613_v16 }
 0x288   :  { %v313_v21 = vpop.f32.mrf.mxu2 }
 0x289   :  { %v317_v22 = vsel %vm1367_vm10, -3.4028235e+38, %v313_v21 }
 0x28a   :  { %v318_v23 = vsel %vm250_vm8, %v317_v22, -inf }
 0x28b   :  { %319 = vmax.xlane.f32.xlu1 %v318_v23 }
 0x290   :  { %v315_v24 = vpop.f32.mrf.mxu2 }
 0x299   :  { %v266_v25 = vpop.f32.mrf.mxu1 }
 0x29a   :  { %v273_v26 = vsel %vm1367_vm10, -3.4028235e+38, %v266_v25  ;;  %v391_v27 = vpop.f32.mrf.mxu0 }
 0x29b   :  { %v395_v28 = vsel %vm1367_vm10, -3.4028235e+38, %v391_v27  ;;  %v274_v29 = vsel %vm250_vm8, %v273_v26, -inf }
 0x29c   :  { %v396_v30 = vsel %vm250_vm8, %v395_v28, -inf  ;;  %275 = vmax.xlane.f32.xlu0 %v274_v29 }
 0x29d   :  { %397 = vmax.xlane.f32.xlu2 %v396_v30 }
 0x29f   :  { %v450_v31 = vpop.f32.mrf.mxu2 }
 0x2a0   :  { %v454_v32 = vsel %vm1367_vm10, -3.4028235e+38, %v450_v31 }
 0x2a1   :  { %v268_v33 = vpop.f32.mrf.mxu1  ;;  %v455_v34 = vsel %vm250_vm8, %v454_v32, -inf }
 0x2a2   :  { %v393_v35 = vpop.f32.mrf.mxu0  ;;  %456 = vmax.xlane.f32.xlu1 %v455_v34  ;;  %v1094_v34 = vld [vmem:[%s1652_s10 + $0x8] sm:$0xff] }
 0x2a3   :  { %520 = vmatpush.bf16.msra.mxu0 %v1094_v34 }
 0x2a7   :  { %v452_v36 = vpop.f32.mrf.mxu2  ;;  %521 = vmatpush.bf16.msra.mxu0 %v1093_v37 }
 0x2af   :  { %v631_v39 = vpop.f32.mrf.mxu2 }
 0x2b0   :  { %v635_v40 = vsel %vm1383_vm11, -3.4028235e+38, %v631_v39 }
 0x2b1   :  { %v636_v41 = vsel %vm250_vm8, %v635_v40, -inf }
 0x2b2   :  { %637 = vmax.xlane.f32.xlu0 %v636_v41 }
 0x2b7   :  { %v633_v42 = vpop.f32.mrf.mxu2 }
 0x2bb   :  { %287 = vrot.lane.b32.xlu1 %v1333_v54, %s1204_s1 }
 0x2c3   :  { %691 = vrot.lane.b32.xlu1 %v1344_v59, %s1200_s21 }
 0x2cb   :  { %750 = vrot.lane.b32.xlu1 %v1344_v59, %s1196_s3 }
 0x2d3   :  { %748 = vrot.lane.b32.xlu1 %v1351_v62, %s1201_s22 }
 0x2fe   :  { %v320_v43 = vpop.xlane.xlu1 %319 }
 0x2ff   :  { %v321_v44 = vsub.f32 %v317_v22, %v320_v43 }
 0x301   :  { %v322_v45 = vmul.f32 1.442695, %v321_v44 }
 0x303   :  { %1133 = vpow2.f32 %v322_v45 }
 0x309   :  { %v1398_v46 = vpop.eup %1133 }
 0x30a   :  { %v324_v47 = vsel %vm250_vm8, %v1398_v46, 0.0 }
 0x30b   :  { %325 = vadd.xlane.f32.xlu2 %v324_v47 }
 0x30f   :  { %v276_v48 = vpop.xlane.xlu0 %275 }
 0x310   :  { %v398_v49 = vpop.xlane.xlu2 %397  ;;  %v277_v50 = vsub.f32 %v273_v26, %v276_v48 }
 0x311   :  { %v399_v51 = vsub.f32 %v395_v28, %v398_v49 }
 0x312   :  { %v278_v52 = vmul.f32 1.442695, %v277_v50 }
 0x313   :  { %v400_v53 = vmul.f32 1.442695, %v399_v51 }
 0x314   :  { %1135 = vpow2.f32 %v278_v52 }
 0x315   :  { %1137 = vpow2.f32 %v400_v53  ;;  %v457_v55 = vpop.xlane.xlu1 %456 }
 0x316   :  { %v458_v56 = vsub.f32 %v454_v32, %v457_v55 }
 0x318   :  { %v459_v57 = vmul.f32 1.442695, %v458_v56 }
 0x31a   :  { %v1402_v60 = vpop.eup %1135  ;;  %1139 = vpow2.f32 %v459_v57 }
 0x31b   :  { %v1404_v61 = vpop.eup %1137  ;;  %v280_v63 = vsel %vm250_vm8, %v1402_v60, 0.0 }
 0x31c   :  { %v402_v1 = vsel %vm250_vm8, %v1404_v61, 0.0  ;;  %281 = vadd.xlane.f32.xlu0 %v280_v63 }
 0x31d   :  { %403 = vadd.xlane.f32.xlu2 %v402_v1 }
 0x320   :  { %v1410_v4 = vpop.eup %1139 }
 0x321   :  { %v461_v5 = vsel %vm250_vm8, %v1410_v4, 0.0 }
 0x324   :  { %462 = vadd.xlane.f32.xlu0 %v461_v5 }
 0x325   :  { %v638_v7 = vpop.xlane.xlu0 %637 }
 0x326   :  { %v639_v8 = vsub.f32 %v635_v40, %v638_v7 }
 0x328   :  { %v640_v9 = vmul.f32 1.442695, %v639_v8 }
 0x32a   :  { %1141 = vpow2.f32 %v640_v9 }
 0x32d   :  { %v288_v13 = vpop.permute.xlu1 %287 }
 0x32e   :  { %v330_v14 = vsel %vm1421_vm1, %v288_v13, 0.0  ;;  %v408_v15 = vsel %vm1425_vm2, %v288_v13, 0.0  ;;  %v290_v16 = vsel %vm189_vm3, %v288_v13, 0.0  ;;  %v467_v28 = vsel %vm1451_vm7, %v288_v13, 0.0 }
 0x32f   :  { %v332_v17 = vpack.c.bf16 %v330_v14, %v330_v14  ;;  %v410_v18 = vpack.c.bf16 %v408_v15, %v408_v15  ;;  %v292_v19 = vpack.c.bf16 %v290_v16, %v290_v16  ;;  %v469_v30 = vpack.c.bf16 %v467_v28, %v467_v28 }
 0x330   :  { %v1436_v21 = vpop.eup %1141 }
 0x331   :  { %v338_v22 = vsel %vm336_vm4, %v332_v17, 0  ;;  %v415_v23 = vsel %vm336_vm4, %v410_v18, 0  ;;  %v642_v24 = vsel %vm250_vm8, %v1436_v21, 0.0  ;;  %v357_v25 = vsel %vm336_vm4, %v292_v19, 0 }
 0x332   :  { %347 = vmatpush.bf16.msra.mxu3 %v338_v22  ;;  %424 = vmatpush.bf16.msrb.mxu1 %v415_v23  ;;  %v474_v33 = vsel %vm336_vm4, %v469_v30, 0 }
 0x333   :  { %643 = vadd.xlane.f32.xlu2 %v642_v24 }
 0x335   :  { %v692_v51 = vpop.permute.xlu1 %691 }
 0x336   :  { %366 = vmatpush.bf16.msrb.mxu3 %v357_v25  ;;  %v697_v57 = vsel %vm250_vm8, %v692_v51, 0 }
 0x338   :  { %568 = vrot.lane.b32.xlu0 %v1344_v59, %s1197_s4  ;;  %s1010_s4 = sshll.u32 %s1658_s16, 4  ;;  %s1011_s4 = int_to_ptr.hbm [resolvable:$true] %s1010_s4 }
 0x33d   :  { %v751_v8 = vpop.permute.xlu1 %750 }
 0x33e   :  { %v756_v6 = vsel %vm250_vm8, %v751_v8, 0  ;;  %v59_v8 = vld [vmem:[%s1644_s2 + $0x8] sm:$0xff] }
 0x340   :  { %689 = vrot.lane.b32.xlu0 %v1351_v62, %s1202_s23 }
 0x345   :  { %v749_v17 = vpop.permute.xlu1 %748 }
 0x34b   :  { %605 = vrot.lane.b32.xlu2 %v1340_v58, %s1204_s1 }
 0x37e   :  { %v326_v26 = vpop.xlane.xlu2 %325 }
 0x37f   :  { %1143 = vrcp.f32 %v326_v26 }
 0x385   :  { %v1144_v59 = vpop.eup %1143 }
 0x386   :  { %v328_v29 = vmul.f32 %v1144_v59, %v1398_v46 }
 0x388   :  { %v329_v31 = vsel %vm1367_vm10, 0.0, %v328_v29 }
 0x389   :  { %v331_v32 = vpack.c.bf16 %v329_v31, %v329_v31 }
 0x38b   :  { %1033 = vmatmul.msk.bf16.vlgmr.msra.gmra.mxu3 %vm250_vm8, %v331_v32 }
 0x38c   :  { %483 = vmatpush.bf16.msra.mxu3 %v474_v33 }
 0x38f   :  { %v282_v35 = vpop.xlane.xlu0 %281 }
 0x390   :  { %v404_v36 = vpop.xlane.xlu2 %403  ;;  %1145 = vrcp.f32 %v282_v35 }
 0x391   :  { %1147 = vrcp.f32 %v404_v36 }
 0x396   :  { %v1146_v39 = vpop.eup %1145 }
 0x397   :  { %v1148_v40 = vpop.eup %1147  ;;  %v284_v41 = vmul.f32 %v1146_v39, %v1402_v60  ;;  %v463_v42 = vpop.xlane.xlu0 %462 }
 0x398   :  { %v406_v43 = vmul.f32 %v1148_v40, %v1404_v61  ;;  %1149 = vrcp.f32 %v463_v42 }
 0x399   :  { %v285_v44 = vsel %vm1367_vm10, 0.0, %v284_v41 }
 0x39a   :  { %v291_v45 = vpack.c.bf16 %v285_v44, %v285_v44  ;;  %v407_v46 = vsel %vm1367_vm10, 0.0, %v406_v43 }
 0x39b   :  { %v409_v47 = vpack.c.bf16 %v407_v46, %v407_v46 }
 0x39c   :  { %1034 = vmatmul.msk.bf16.vlgmr.msrb.gmra.mxu3 %vm250_vm8, %v291_v45 }
 0x39d   :  { %1036 = vmatmul.msk.bf16.vlgmr.msrb.gmra.mxu1 %vm250_vm8, %v409_v47 }
 0x39e   :  { %v1150_v48 = vpop.eup %1149 }
 0x39f   :  { %v465_v49 = vmul.f32 %v1150_v48, %v1410_v4 }
 0x3a1   :  { %v466_v52 = vsel %vm1367_vm10, 0.0, %v465_v49 }
 0x3a2   :  { %v468_v53 = vpack.c.bf16 %v466_v52, %v466_v52 }
 0x3a6   :  { %v644_v50 = vpop.xlane.xlu2 %643 }
 0x3a7   :  { %1151 = vrcp.f32 %v644_v50 }
 0x3aa   :  { %v569_v55 = vpop.permute.xlu0 %568 }
 0x3ab   :  { %v574_v56 = vsel %vm250_vm8, %v569_v55, 0 }
 0x3ac   :  { %1038 = vmatmul.msk.bf16.vlgmr.msra.gmra.mxu3 %vm250_vm8, %v468_v53  ;;  %583 = vmatpush.bf16.xpose.msra.mxu1 %v574_v56 }
 0x3ad   :  { %v1152_v1 = vpop.eup %1151 }
 0x3ae   :  { %v606_v60 = vpop.permute.xlu2 %605  ;;  %v646_v11 = vmul.f32 %v1152_v1, %v1436_v21 }
 0x3af   :  { %v648_v61 = vsel %vm1421_vm1, %v606_v60, 0.0  ;;  %v608_v63 = vsel %vm189_vm3, %v606_v60, 0.0  ;;  %v725_v20 = vsel %vm1425_vm2, %v606_v60, 0.0  ;;  %v784_v25 = vsel %vm1451_vm7, %v606_v60, 0.0 }
 0x3b0   :  { %v650_v4 = vpack.c.bf16 %v648_v61, %v648_v61  ;;  %v610_v5 = vpack.c.bf16 %v608_v63, %v608_v63  ;;  %v727_v7 = vpack.c.bf16 %v725_v20, %v725_v20  ;;  %v647_v12 = vsel %vm1383_vm11, 0.0, %v646_v11 }
 0x3b1   :  { %v649_v15 = vpack.c.bf16 %v647_v12, %v647_v12  ;;  %v786_v29 = vpack.c.bf16 %v784_v25, %v784_v25  ;;  %vm982_vm3 = vcmask 523264  }
 0x3b2   :  { %v655_v9 = vsel %vm336_vm4, %v650_v4, 0  ;;  %v674_v13 = vsel %vm336_vm4, %v610_v5, 0  ;;  %v732_v14 = vsel %vm336_vm4, %v727_v7, 0  ;;  %v690_v16 = vpop.permute.xlu0 %689  ;;  %v58_v4 = vld [vmem:[%s1644_s2] sm:$0xff] }
 0x3b3   :  { %664 = vmatpush.bf16.msrb.mxu3 %v655_v9  ;;  %683 = vmatpush.bf16.msrb.mxu0 %v674_v13  ;;  %v791_v34 = vsel %vm336_vm4, %v786_v29, 0  ;;  %v1529_v9 = vld [vmem:[%s1651_s9] sm:$0x1f] }
 0x3b4   :  { %706 = vmatpush.bf16.xpose.msrb.mxu1 %v697_v57  ;;  %741 = vmatpush.bf16.msrb.mxu2 %v732_v14  ;;  %v222_v13 = vperm.slane %v1529_v9, 2 }
 0x3b5   :  { %1048 = vmatmul.msk.bf16.vlgmr.msra.gmra.mxu1 %vm250_vm8, %v1351_v62 }
 0x3b7   :  { %765 = vmatpush.bf16.xpose.msra.mxu3 %v756_v6 }
 0x3bc   :  { %1050 = vmatmul.msk.bf16.vlgmr.msrb.gmra.mxu3 %vm250_vm8, %v649_v15 }
 0x3c5   :  { %1052 = vmatmul.msk.bf16.vlgmr.msrb.gmra.mxu1 %vm250_vm8, %v690_v16 }
 0x3cc   :  { %1054 = vmatmul.msk.bf16.vlgmr.msra.gmra.mxu3 %vm250_vm8, %v749_v17 }
 0x40e   :  { %v349_v18 = vpop.f32.mrf.mxu3 }
 0x416   :  { %v351_v19 = vpop.f32.mrf.mxu3 }
 0x41a   :  { %v426_v21 = vpop.f32.mrf.mxu1 }
 0x41f   :  { %v368_v22 = vpop.f32.mrf.mxu3 }
 0x420   :  { %v369_v62 = vadd.f32 %v368_v22, %v349_v18 }
 0x422   :  { %v428_v23 = vpop.f32.mrf.mxu1  ;;  %v430_v26 = vadd.f32 %v426_v21, %v369_v62 }
 0x427   :  { %v370_v24 = vpop.f32.mrf.mxu3 }
 0x42f   :  { %v485_v28 = vpop.f32.mrf.mxu3 }
 0x430   :  { %v489_v59 = vadd.f32 %v485_v28, %v430_v26 }
 0x432   :  { %v585_v30 = vpop.f32.mrf.mxu1  ;;  %v490_v31 = vpack.c.bf16 %v489_v59, %v489_v59 }
 0x433   :  { %v591_v32 = vsel %vm1383_vm11, -3.4028235e+38, %v585_v30 }
 0x434   :  { %v592_v33 = vsel %vm250_vm8, %v591_v32, -inf  ;;  %1047 = vmatmul.msk.bf16.vlgmr.msra.gmra.mxu0 %vm63_vm0, %v490_v31 }
 0x435   :  { %593 = vmax.xlane.f32.xlu2 %v592_v33  ;;  %800 = vmatpush.bf16.msra.mxu0 %v791_v34 }
 0x437   :  { %v487_v35 = vpop.f32.mrf.mxu3 }
 0x43a   :  { %v587_v27 = vpop.f32.mrf.mxu1 }
 0x43f   :  { %v1507_v36 = vpop.f32.mrf.mxu3 }
 0x442   :  { %v708_v37 = vpop.f32.mrf.mxu1 }
 0x443   :  { %v712_v39 = vsel %vm1383_vm11, -3.4028235e+38, %v708_v37 }
 0x444   :  { %v713_v40 = vsel %vm250_vm8, %v712_v39, -inf }
 0x445   :  { %714 = vmax.xlane.f32.xlu0 %v713_v40  ;;  %v213_v40 = vperm.slane %v1529_v9, 0 }
 0x447   :  { %v668_v41 = vpop.f32.mrf.mxu3 }
 0x448   :  { %v218_v41 = vperm.slane %v1529_v9, 1 }
 0x44a   :  { %v710_v42 = vpop.f32.mrf.mxu1 }
 0x44f   :  { %v767_v43 = vpop.f32.mrf.mxu3 }
 0x450   :  { %v771_v44 = vsel %vm1383_vm11, -3.4028235e+38, %v767_v43 }
 0x451   :  { %v772_v45 = vsel %vm250_vm8, %v771_v44, -inf }
 0x452   :  { %773 = vmax.xlane.f32.xlu1 %v772_v45 }
 0x457   :  { %v769_v46 = vpop.f32.mrf.mxu3 }
 0x4a8   :  { %v594_v47 = vpop.xlane.xlu2 %593 }
 0x4a9   :  { %v595_v48 = vsub.f32 %v591_v32, %v594_v47  ;;  %v166_v32 = vshrl.u32 %v165_v3, 7  ;;  %v1095_v3 = vld [vmem:[%s1652_s10] sm:$0xff] }
 0x4ab   :  { %v596_v49 = vmul.f32 1.442695, %v595_v48  ;;  %v169_v38 = vadd.s32 4294967294, %v166_v32  ;;  %v173_v34 = vadd.s32 4294967295, %v166_v32 }
 0x4ad   :  { %1153 = vpow2.f32 %v596_v49  ;;  %vm174_vm9 = vcmp.ge.s32.totalorder %v173_v34, 0  ;;  %v235_v49 = vperm.slane %v1529_v9, 3 }
 0x4b1   :  { %v1515_v50 = vpop.f32.mrf.mxu0 }
 0x4b3   :  { %v1154_v51 = vpop.eup %1153 }
 0x4b4   :  { %v598_v52 = vsel %vm250_vm8, %v1154_v51, 0.0 }
 0x4b5   :  { %599 = vadd.xlane.f32.xlu2 %v598_v52  ;;  %v1121_v52 = vld [vmem:[%s1653_s11] ss:$0 sm:$0xff] }
 0x4b8   :  { %v715_v53 = vpop.xlane.xlu0 %714 }
 0x4b9   :  { %v716_v55 = vsub.f32 %v712_v39, %v715_v53  ;;  %v525_v56 = vpop.f32.mrf.mxu0  ;;  %v180_v39 = vadd.s32 1, %v166_v32 }
 0x4ba   :  { %v240_v56 = vperm.slane %v1529_v9, 4 }
 0x4bb   :  { %v717_v57 = vmul.f32 1.442695, %v716_v55  ;;  %vm182_vm10 = vcmp.lt.s32.totalorder %v180_v39, 8 }
 0x4bd   :  { %1155 = vpow2.f32 %v717_v57 }
 0x4c3   :  { %v1156_v60 = vpop.eup %1155 }
 0x4c4   :  { %v719_v61 = vsel %vm250_vm8, %v1156_v60, 0.0 }
 0x4c5   :  { %720 = vadd.xlane.f32.xlu0 %v719_v61  ;;  %v774_v63 = vpop.xlane.xlu1 %773 }
 0x4c6   :  { %v775_v20 = vsub.f32 %v771_v44, %v774_v63  ;;  %v184_v44 = vadd.s32 2, %v166_v32 }
 0x4c8   :  { %v776_v1 = vmul.f32 1.442695, %v775_v20  ;;  %v524_v20 = vadd.f32 %v1121_v52, %v1515_v50 }
 0x4ca   :  { %1157 = vpow2.f32 %v776_v1 }
 0x4cd   :  { %203 = vperm.xlu2 %1116, %v58_v4  }
 0x4d0   :  { %v1158_v5 = vpop.eup %1157 }
 0x4d1   :  { %v778_v7 = vsel %vm250_vm8, %v1158_v5, 0.0 }
 0x4d2   :  { %779 = vadd.xlane.f32.xlu1 %v778_v7 }
 0x4d9   :  { %532 = vperm.xlu0 %1117, %v59_v8  }
 0x4eb   :  { %224 = vrot.lane.b32.xlu1 %v222_v13, %s1204_s1 }
 0x528   :  { %v600_v14 = vpop.xlane.xlu2 %599 }
 0x529   :  { %1159 = vrcp.f32 %v600_v14 }
 0x52f   :  { %v1160_v11 = vpop.eup %1159 }
 0x530   :  { %v602_v6 = vmul.f32 %v1160_v11, %v1154_v51  ;;  %v1533_v12 = vpop.permute.xlu2 %203 }
 0x531   :  { %v206_v15 = vmul.f32 %v1533_v12, %v1333_v54 }
 0x532   :  { %v603_v16 = vsel %vm1383_vm11, 0.0, %v602_v6  ;;  %v527_v6 = vadd.f32 %v524_v20, %v1296_v0 }
 0x533   :  { %v609_v17 = vpack.c.bf16 %v603_v16, %v603_v16  ;;  %208 = vrot.lane.b32.xlu2 %v206_v15, %s1204_s1 }
 0x535   :  { %1051 = vmatmul.msk.bf16.vlgmr.msrb.gmra.mxu0 %vm250_vm8, %v609_v17 }
 0x538   :  { %v721_v18 = vpop.xlane.xlu0 %720 }
 0x539   :  { %1161 = vrcp.f32 %v721_v18 }
 0x53f   :  { %v1162_v19 = vpop.eup %1161 }
 0x540   :  { %v723_v21 = vmul.f32 %v1162_v19, %v1156_v60 }
 0x542   :  { %v724_v22 = vsel %vm1383_vm11, 0.0, %v723_v21 }
 0x543   :  { %v726_v23 = vpack.c.bf16 %v724_v22, %v724_v22 }
 0x545   :  { %1053 = vmatmul.msk.bf16.vlgmr.msrb.gmra.mxu2 %vm250_vm8, %v726_v23  ;;  %v780_v24 = vpop.xlane.xlu1 %779 }
 0x546   :  { %1163 = vrcp.f32 %v780_v24 }
 0x54b   :  { %v1544_v54 = vpop.permute.xlu0 %532 }
 0x54c   :  { %v535_v62 = vmul.f32 %v1544_v54, %v1340_v58  ;;  %v1164_v25 = vpop.eup %1163  ;;  %v1096_v58 = vld [vmem:[%s1652_s10 + $0x8] sm:$0xff] }
 0x54d   :  { %v782_v26 = vmul.f32 %v1164_v25, %v1158_v5  ;;  %837 = vmatpush.bf16.msra.mxu1 %v1096_v58 }
 0x54e   :  { %537 = vrot.lane.b32.xlu1 %v535_v62, %s1204_s1 }
 0x54f   :  { %v783_v28 = vsel %vm1383_vm11, 0.0, %v782_v26  ;;  %vm186_vm11 = vcmp.lt.s32.totalorder %v184_v44, 8 }
 0x550   :  { %v785_v59 = vpack.c.bf16 %v783_v28, %v783_v28 }
 0x551   :  { %838 = vmatpush.bf16.msra.mxu1 %v1095_v3 }
 0x552   :  { %1055 = vmatmul.msk.bf16.vlgmr.msra.gmra.mxu0 %vm250_vm8, %v785_v59  ;;  %vm170_vm8 = vcmp.ge.s32.totalorder %v169_v38, 0 }
 0x55d   :  { %v225_v29 = vpop.permute.xlu1 %224 }
 0x55e   :  { %v227_v30 = vmul.f32 %v225_v29, %v206_v15  ;;  %v549_v31 = vmul.f32 %v535_v62, %v225_v29 }
 0x560   :  { %229 = vrot.lane.b32.xlu2 %v227_v30, %s1204_s1  ;;  %551 = vrot.lane.b32.xlu1 %v549_v31, %s1204_s1 }
 0x58d   :  { %v209_v33 = vpop.permute.xlu2 %208 }
 0x58e   :  { %v211_v35 = vrot.slane %v209_v33, 6  ;;  %v216_v27 = vrot.slane %v209_v33, 7  ;;  %v233_v45 = vrot.slane %v209_v33, 1  ;;  %v238_v48 = vrot.slane %v209_v33, 2 }
 0x590   :  { %v212_v42 = vsel %vm170_vm8, %v211_v35, 0.0  ;;  %v217_v43 = vsel %vm174_vm9, %v216_v27, 0.0  ;;  %v234_v51 = vsel %vm182_vm10, %v233_v45, 0.0  ;;  %v239_v57 = vsel %vm186_vm11, %v238_v48, 0.0 }
 0x591   :  { %v214_v46 = vmul.f32 %v213_v40, %v212_v42  ;;  %v219_v47 = vmul.f32 %v218_v41, %v217_v43  ;;  %v236_v61 = vmul.f32 %v235_v49, %v234_v51  ;;  %v241_v1 = vmul.f32 %v240_v56, %v239_v57  ;;  %v1098_v57 = vld [vmem:[%s1654_s12 + $0x8] sm:$0xff] }
 0x592   :  { %935 = vmatpush.bf16.msra.mxu2 %v1098_v57 }
 0x593   :  { %v220_v55 = vadd.f32 %v219_v47, %v214_v46 }
 0x5b2   :  { %v685_v37 = vpop.f32.mrf.mxu0 }
 0x5b3   :  { %v686_v25 = vadd.f32 %v685_v37, %v1507_v36 }
 0x5ba   :  { %v687_v53 = vpop.f32.mrf.mxu0  ;;  %v230_v60 = vpop.permute.xlu2 %229 }
 0x5bb   :  { %v232_v63 = vadd.f32 %v230_v60, %v220_v55 }
 0x5bd   :  { %v237_v4 = vadd.f32 %v236_v61, %v232_v63  ;;  %v1097_v61 = vld [vmem:[%s1654_s12] sm:$0xff] }
 0x5be   :  { %936 = vmatpush.bf16.msra.mxu2 %v1097_v61 }
 0x5bf   :  { %v242_v5 = vadd.f32 %v241_v1, %v237_v4 }
 0x5c0   :  { %v538_v7 = vpop.permute.xlu1 %537 }
 0x5c1   :  { %v559_v8 = vrot.slane %v538_v7, 2  ;;  %v540_v13 = vrot.slane %v538_v7, 6  ;;  %v544_v14 = vrot.slane %v538_v7, 7  ;;  %v555_v11 = vrot.slane %v538_v7, 1 }
 0x5c2   :  { %v243_v15 = vadd.f32 %v242_v5, %v209_v33 }
 0x5c3   :  { %v541_v9 = vsel %vm170_vm8, %v540_v13, 0.0  ;;  %v545_v16 = vsel %vm174_vm9, %v544_v14, 0.0  ;;  %v556_v17 = vsel %vm182_vm10, %v555_v11, 0.0  ;;  %v560_v18 = vsel %vm186_vm11, %v559_v8, 0.0 }
 0x5c4   :  { %v244_v50 = vmul.f32 %v243_v15, %v1533_v12  ;;  %v542_v19 = vmul.f32 %v541_v9, %v213_v40  ;;  %v546_v21 = vmul.f32 %v545_v16, %v218_v41  ;;  %v557_v22 = vmul.f32 %v556_v17, %v235_v49  ;;  %v1122_v40 = vld [vmem:[%s1653_s11] ss:$0 sm:$0xff] }
 0x5c5   :  { %v561_v23 = vmul.f32 %v560_v18, %v240_v56  ;;  %v1123_v17 = vld [vmem:[%s1647_s5] ss:$0 sm:$0xff] }
 0x5c6   :  { %v528_v24 = vadd.f32 %v527_v6, %v244_v50  ;;  %v547_v62 = vadd.f32 %v546_v21, %v542_v19  ;;  %v1124_v19 = vld [vmem:[%s1648_s6] ss:$0 sm:$0xff] }
 0x5c8   :  { %529 = vst.msk [vmem:[#allocation2] sm:$0xff] %vm63_vm0, %v528_v24  ;;  %v743_v0 = vpop.f32.mrf.mxu2 }
 0x5c9   :  { %v747_v26 = vadd.f32 %v743_v0, %v686_v25  ;;  %v1102_v25 = vld [vmem:[%s1656_s14 + $0x18] sm:$0xff] }
 0x5ca   :  { %990 = vmatpush.bf16.msrb.mxu3 %v1102_v25 }
 0x5cf   :  { %v1581_v28 = vld [vmem:[#allocation2] sm:$0xff]  ;;  %v802_v29 = vpop.f32.mrf.mxu0 }
 0x5d0   :  { %v745_v59 = vpop.f32.mrf.mxu2  ;;  %v851_v30 = vsel %vm63_vm0, %v1581_v28, 0.0  ;;  %v806_v12 = vadd.f32 %v802_v29, %v747_v26  ;;  %v1101_v26 = vld [vmem:[%s1656_s14 + $0x10] sm:$0xff]  ;;  %v1099_v29 = vld [vmem:[%s1656_s14] sm:$0xff] }
 0x5d1   :  { %852 = vadd.xlane.f32.xlu2 %v851_v30  ;;  %991 = vmatpush.bf16.msrb.mxu3 %v1101_v26  ;;  %v1100_v59 = vld [vmem:[%s1656_s14 + $0x8] sm:$0xff]  ;;  %s1205_s14 = smov [#allocation2]  }
 0x5d2   :  { %v807_v31 = vpack.c.bf16 %v806_v12, %v806_v12  ;;  %v552_v32 = vpop.permute.xlu1 %551  ;;  %v1125_v12 = vld [vmem:[%s1655_s13] ss:$0 sm:$0xff]  ;;  %s1008_s13 = sshll.u32 %s1205_s14, 4  ;;  %s1009_s13 = int_to_ptr.vmem [resolvable:$true] %s1008_s13 }
 0x5d3   :  { %v554_v58 = vadd.f32 %v552_v32, %v547_v62 }
 0x5d4   :  { %1064 = vmatmul.msk.bf16.vlgmr.msra.gmra.mxu1 %vm63_vm0, %v807_v31 }
 0x5d5   :  { %v558_v33 = vadd.f32 %v557_v22, %v554_v58  ;;  %992 = vmatpush.bf16.msrb.mxu3 %v1100_v59 }
 0x5d7   :  { %v562_v38 = vadd.f32 %v561_v23, %v558_v33  ;;  %v804_v34 = vpop.f32.mrf.mxu0 }
 0x5d9   :  { %v563_v41 = vadd.f32 %v562_v38, %v538_v7  ;;  %993 = vmatpush.bf16.msrb.mxu3 %v1099_v29 }
 0x5db   :  { %v564_v43 = vmul.f32 %v563_v41, %v1544_v54 }
 0x644   :  { %v853_v35 = vpop.xlane.xlu2 %852 }
 0x645   :  { %v857_v36 = vmul.f32 %v853_v35, %v1307_v10  ;;  %v1126_v35 = vld [vmem:[%s1657_s15] ss:$0 sm:$0xff]  ;;  %s1206_s15 = smov 128  }
 0x647   :  { %v859_v27 = vsub.f32 %v1581_v28, %v857_v36 }
 0x649   :  { %v861_v37 = vmul.f32 %v859_v27, %v859_v27 }
 0x64b   :  { %v863_v39 = vsel %vm63_vm0, %v861_v37, 0.0 }
 0x64c   :  { %864 = vadd.xlane.f32.xlu1 %v863_v39 }
 0x651   :  { %v840_v3 = vpop.f32.mrf.mxu1 }
 0x652   :  { %v841_v42 = vadd.f32 %v1122_v40, %v840_v3 }
 0x654   :  { %v844_v44 = vadd.f32 %v841_v42, %v1303_v2 }
 0x656   :  { %v845_v45 = vadd.f32 %v844_v44, %v564_v43 }
 0x658   :  { %846 = vst.msk [vmem:[#allocation2 + $0x8] sm:$0xff] %vm63_vm0, %v845_v45 }
 0x659   :  { %v842_v46 = vpop.f32.mrf.mxu1 }
 0x65f   :  { %v1595_v47 = vld [vmem:[#allocation2 + $0x8] sm:$0xff] }
 0x660   :  { %v854_v48 = vsel %vm63_vm0, %v1595_v47, 0.0 }
 0x661   :  { %855 = vadd.xlane.f32.xlu0 %v854_v48 }
 0x6bf   :  { %v865_v2 = vpop.xlane.xlu1 %864 }
 0x6c0   :  { %v869_v55 = vmul.f32 %v865_v2, %v1307_v10 }
 0x6c2   :  { %v871_v56 = vadd.f32 1e-12, %v869_v55 }
 0x6c4   :  { %1165 = vrsqrt.f32 %v871_v56  ;;  %vm879_vm13 = vweird.f32 %v871_v56 }
 0x6ca   :  { %v1166_v60 = vpop.eup %1165 }
 0x6cb   :  { %v874_v63 = vmul.f32 %v1166_v60, %v871_v56  ;;  %vm880_vm12 = vweird.f32 %v1166_v60 }
 0x6cc   :  { %vm881_vm14 = vmor %vm879_vm13, %vm880_vm12 }
 0x6cd   :  { %v875_v20 = vmul.f32 %v1166_v60, %v874_v63 }
 0x6cf   :  { %v876_v7 = vmul.f32 0.5, %v875_v20 }
 0x6d1   :  { %v877_v8 = vsub.f32 1.5, %v876_v7 }
 0x6d3   :  { %v878_v14 = vmul.f32 %v1166_v60, %v877_v8 }
 0x6d4   :  { %v856_v49 = vpop.xlane.xlu0 %855 }
 0x6d5   :  { %v858_v51 = vmul.f32 %v856_v49, %v1307_v10  ;;  %v882_v15 = vsel %vm881_vm14, %v1166_v60, %v878_v14 }
 0x6d7   :  { %v860_v52 = vsub.f32 %v1595_v47, %v858_v51 }
 0x6d9   :  { %v862_v53 = vmul.f32 %v860_v52, %v860_v52 }
 0x6db   :  { %v866_v54 = vsel %vm63_vm0, %v862_v53, 0.0 }
 0x6dc   :  { %867 = vadd.xlane.f32.xlu2 %v866_v54 }
 0x74f   :  { %v868_v1 = vpop.xlane.xlu2 %867 }
 0x750   :  { %v870_v4 = vmul.f32 %v868_v1, %v1307_v10  ;;  %v893_v10 = vmul.f32 %v882_v15, %v859_v27 }
 0x752   :  { %v872_v5 = vadd.f32 1e-12, %v870_v4  ;;  %v898_v21 = vmul.f32 %v1123_v17, %v893_v10 }
 0x754   :  { %1167 = vrsqrt.f32 %v872_v5  ;;  %vm889_vm1 = vweird.f32 %v872_v5  ;;  %v903_v24 = vadd.f32 %v1124_v19, %v898_v21 }
 0x75a   :  { %v1168_v13 = vpop.eup %1167 }
 0x75b   :  { %v884_v11 = vmul.f32 %v1168_v13, %v872_v5  ;;  %vm890_vm15 = vweird.f32 %v1168_v13 }
 0x75c   :  { %vm891_vm2 = vmor %vm889_vm1, %vm890_vm15 }
 0x75d   :  { %v885_v6 = vmul.f32 %v1168_v13, %v884_v11 }
 0x75f   :  { %v886_v9 = vmul.f32 0.5, %v885_v6 }
 0x761   :  { %v887_v16 = vsub.f32 1.5, %v886_v9 }
 0x763   :  { %v888_v18 = vmul.f32 %v1168_v13, %v887_v16 }
 0x765   :  { %v892_v50 = vsel %vm891_vm2, %v1168_v13, %v888_v18 }
 0x766   :  { %v894_v22 = vmul.f32 %v892_v50, %v860_v52 }
 0x768   :  { %v899_v23 = vmul.f32 %v1123_v17, %v894_v22 }
 0x76a   :  { %v904_v62 = vadd.f32 %v1124_v19, %v899_v23 }
 0x76c   :  { %v905_v0 = vpack.c.bf16 %v904_v62, %v903_v24 }
 0x76e   :  { %1073 = vmatmul.msk.bf16.vlgmr.msra.gmra.mxu2 %vm63_vm0, %v905_v0 }
 0x7f1   :  { %v938_v30 = vpop.f32.mrf.mxu2 }
 0x7f2   :  { %v939_v31 = vadd.f32 %v1125_v12, %v938_v30 }
 0x7f4   :  { %v943_v33 = vmax.f32 %v939_v31, 0.0 }
 0x7f9   :  { %v940_v32 = vpop.f32.mrf.mxu2 }
 0x7fa   :  { %v941_v58 = vadd.f32 %v1125_v12, %v940_v32 }
 0x7fc   :  { %v944_v38 = vmax.f32 %v941_v58, 0.0 }
 0x7fe   :  { %v945_v34 = vpack.c.bf16 %v944_v38, %v943_v33 }
 0x800   :  { %1090 = vmatmul.msk.bf16.vlgmr.msrb.gmra.mxu3 %vm982_vm3, %v945_v34 }
 0x883   :  { %v995_v36 = vpop.f32.mrf.mxu3 }
 0x884   :  { %v996_v27 = vadd.f32 %v1126_v35, %v995_v36 }
 0x886   :  { %v1000_v37 = vadd.f32 %v996_v27, %v1581_v28 }
 0x888   :  { %1002 = vst.msk [vmem:[#allocation2] sm:$0xff] %vm63_vm0, %v1000_v37 }
 0x88b   :  { %v997_v39 = vpop.f32.mrf.mxu3 }
 0x88c   :  { %v998_v40 = vadd.f32 %v1126_v35, %v997_v39 }
 0x88e   :  { %v1001_v41 = vadd.f32 %v998_v40, %v1595_v47 }
 0x890   :  { %1003 = vst.msk [vmem:[#allocation2 + $0x8] sm:$0xff] %vm63_vm0, %v1001_v41 }
 0x891   :  { %1016 = dma.vmem_to_hbm [thread:$0]  %s1009_s13, 256, %s1011_s4, [#allocation3], %s1206_s15, %s1206_s15, %s1207_s20  }
 0x892   :  { %1193 = dma.done.wait [#allocation3], 256  }
 0x893   :  { %1194 = vsyncadd [#allocation3], 4294967040 }
 0x894   :  { %1021 = vsyncpa [#allocation3], 1 }

</bundles_post_ra>
